<compile_context>
chip_gen: v6e
topology: v6e:2x2x1
jax: 0.10.0
libtpu: 0.0.40
codegen_flags: <defaults>
</compile_context>

<pallas_src>
import functools

import jax
import jax.numpy as jnp
from jax.experimental import pallas as pl
from jax.experimental.pallas import tpu as pltpu


# ------------------------------ fused kernel --------------------------------

def _fused_kernel(x_ref, w0_ref, b0_ref, w1_ref, b1_ref, w2_ref, b2_ref,
                  out_ref, v1_ref, v2_ref, v3_ref, *, N, H):
    """Fused 1x1-conv chain + addmm + channel-concat, all VMEM-resident.

    x_ref:   (N*3*H, W)  flattened NCHW input            (VMEM)
    w*_ref:  (c_out, c_in)  conv weights                  (SMEM scalars)
    b*_ref:  (c_out,)       conv biases                   (SMEM scalars)
    out_ref: (N*12*H, W)  flattened NCHW cat([v2, v4])    (VMEM)
    v*_ref:  VMEM scratch for the conv-chain intermediates.
    """

    def rows(n, c, C):
        # row-slice of channel c of sample n in a (N*C*H, W) flattened matrix
        return slice((n * C + c) * H, (n * C + c + 1) * H)

    # ---- conv0: 3 -> 3  (unrolled VPU broadcast-FMA over channels) ----
    for n in range(N):
        xb = [x_ref[rows(n, k, 3), :] for k in range(3)]
        for c in range(3):
            v1_ref[rows(n, c, 3), :] = (
                xb[0] * w0_ref[c, 0] + xb[1] * w0_ref[c, 1]
                + xb[2] * w0_ref[c, 2] + b0_ref[c])

    # ---- conv1: 3 -> 6 ----
    for n in range(N):
        vb = [v1_ref[rows(n, k, 3), :] for k in range(3)]
        for c in range(6):
            v2_ref[rows(n, c, 6), :] = (
                vb[0] * w1_ref[c, 0] + vb[1] * w1_ref[c, 1]
                + vb[2] * w1_ref[c, 2] + b1_ref[c])

    # ---- conv2: 6 -> 6 ----
    for n in range(N):
        vb = [v2_ref[rows(n, k, 6), :] for k in range(6)]
        for c in range(6):
            acc = vb[0] * w2_ref[c, 0]
            for k in range(1, 6):
                acc = acc + vb[k] * w2_ref[c, k]
            v3_ref[rows(n, c, 6), :] = acc + b2_ref[c]

    # ---- repaired addmm: v4 = v3 + v2 @ (v1 * 8) on flattened matrices ----
    # (the *8 scale is folded into a single scalar multiply of the product)
    v4 = v3_ref[...] + 8.0 * jnp.dot(v2_ref[...], v1_ref[...],
                                     preferred_element_type=jnp.float32)

    # ---- cat([v2, v4], dim=1) written directly into the fused output ----
    for n in range(N):
        out_ref[n * 12 * H:(n * 12 + 6) * H, :] = \
            v2_ref[n * 6 * H:(n + 1) * 6 * H, :]
        out_ref[(n * 12 + 6) * H:(n + 1) * 12 * H, :] = \
            v4[n * 6 * H:(n + 1) * 6 * H, :]


def fused_forward(x_mat, w0, b0, w1, b1, w2, b2, *, N, H, W):
    kernel = functools.partial(_fused_kernel, N=N, H=H)
    smem = pl.BlockSpec(memory_space=pltpu.MemorySpace.SMEM)
    vmem = pl.BlockSpec(memory_space=pltpu.MemorySpace.VMEM)
    return pl.pallas_call(
        kernel,
        out_shape=jax.ShapeDtypeStruct((N * 12 * H, W), jnp.float32),
        in_specs=[vmem, smem, smem, smem, smem, smem, smem],
        out_specs=vmem,
        scratch_shapes=[
            pltpu.VMEM((N * 3 * H, W), jnp.float32),   # v1
            pltpu.VMEM((N * 6 * H, W), jnp.float32),   # v2
            pltpu.VMEM((N * 6 * H, W), jnp.float32),   # v3
        ],
    )(x_mat, w0, b0, w1, b1, w2, b2)


# ------------------------------ model wrapper --------------------------------

def model_forward(x1, params):
    """x1: (N, 3, H, W) float32, NCHW.  Returns (N, 12, H, W)."""
    (w0, b0), (w1, b1), (w2, b2) = params
    N, Cin, H, W = x1.shape
    assert Cin == 3
    assert W == N * 3 * H, "repaired addmm semantics require W == N*3*H"

    x_mat = x1.reshape(N * 3 * H, W)            # free NCHW flatten
    out_mat = fused_forward(x_mat, w0, b0, w1, b1, w2, b2, N=N, H=H, W=W)
    return out_mat.reshape(N, 12, H, W)         # free reshape back to NCHW


# ----------------------------------- main ------------------------------------

if __name__ == "__main__":
    key = jax.random.PRNGKey(0)
    ks = iter(jax.random.split(key, 8))

    # Small shapes consistent with the module (NCHW, 3 input channels).
    # W == N*3*H so the repaired addmm semantics are well-defined.
    N, Cin, H, W = 1, 3, 16, 48
    x1 = jax.random.normal(next(ks), (N, Cin, H, W), jnp.float32)

    def conv_params(kw, kb, cin, cout):
        # PyTorch Conv2d default init (uniform +-1/sqrt(fan_in)); weight stored
        # PyTorch-style as (c_out, c_in).
        bound = 1.0 / (cin ** 0.5)
        w = jax.random.uniform(kw, (cout, cin), jnp.float32, -bound, bound)
        b = jax.random.uniform(kb, (cout,), jnp.float32, -bound, bound)
        return w, b

    p0 = conv_params(next(ks), next(ks), 3, 3)   # conv0: 3 -> 3
    p1 = conv_params(next(ks), next(ks), 3, 6)   # conv1: 3 -> 6
    p2 = conv_params(next(ks), next(ks), 6, 6)   # conv2: 6 -> 6
    params = (p0, p1, p2)

    out = jax.block_until_ready(model_forward(x1, params))

    # -------- pure-JAX reference --------
    def conv1x1_ref(x, w, b):
        return jnp.einsum('nkhw,ck->nchw', x, w) + b.reshape(1, -1, 1, 1)

    r1 = conv1x1_ref(x1, *p0)
    r2 = conv1x1_ref(r1, *p1)
    r3 = conv1x1_ref(r2, *p2)
    r4 = (r3.reshape(N * 6 * H, W)
          + r2.reshape(N * 6 * H, W) @ (r1.reshape(N * 3 * H, W) * 8.0))
    ref = jnp.concatenate([r2, r4.reshape(N, 6, H, W)], axis=1)

    assert out.shape == (N, 12, H, W), out.shape
    assert jnp.allclose(out, ref, atol=1e-4, rtol=1e-4), float(
        jnp.max(jnp.abs(out - ref)))
    print("KERNEL_OK")
</pallas_src>

<mosaic_0001>
module attributes {stable_mosaic.version = 11 : i64} {
  func.func @_fused_kernel(%arg0: memref<48x48xf32, #tpu.memory_space<vmem>>, %arg1: memref<3x3xf32, #tpu.memory_space<smem>>, %arg2: memref<3xf32, #tpu.memory_space<smem>>, %arg3: memref<6x3xf32, #tpu.memory_space<smem>>, %arg4: memref<6xf32, #tpu.memory_space<smem>>, %arg5: memref<6x6xf32, #tpu.memory_space<smem>>, %arg6: memref<6xf32, #tpu.memory_space<smem>>, %arg7: memref<192x48xf32, #tpu.memory_space<vmem>>, %arg8: memref<48x48xf32, #tpu.memory_space<vmem>>, %arg9: memref<96x48xf32, #tpu.memory_space<vmem>>, %arg10: memref<96x48xf32, #tpu.memory_space<vmem>>) attributes {dimension_semantics = [], scalar_prefetch = 0 : i64, scratch_operands = 3 : i64, tpu.core_type = #tpu.core_type<tc>} {
    %c0 = arith.constant 0 : index
    %c0_0 = arith.constant 0 : index
    %0 = vector.load %arg0[%c0, %c0_0] : memref<48x48xf32, #tpu.memory_space<vmem>>, vector<16x48xf32>
    %c16 = arith.constant 16 : index
    %c0_1 = arith.constant 0 : index
    %1 = vector.load %arg0[%c16, %c0_1] : memref<48x48xf32, #tpu.memory_space<vmem>>, vector<16x48xf32>
    %c32 = arith.constant 32 : index
    %c0_2 = arith.constant 0 : index
    %2 = vector.load %arg0[%c32, %c0_2] : memref<48x48xf32, #tpu.memory_space<vmem>>, vector<16x48xf32>
    %c0_3 = arith.constant 0 : index
    %c0_4 = arith.constant 0 : index
    %3 = memref.load %arg1[%c0_3, %c0_4] : memref<3x3xf32, #tpu.memory_space<smem>>
    %4 = vector.broadcast %3 : f32 to vector<16x48xf32>
    %5 = arith.mulf %0, %4 : vector<16x48xf32>
    %c0_5 = arith.constant 0 : index
    %c1 = arith.constant 1 : index
    %6 = memref.load %arg1[%c0_5, %c1] : memref<3x3xf32, #tpu.memory_space<smem>>
    %7 = vector.broadcast %6 : f32 to vector<16x48xf32>
    %8 = arith.mulf %1, %7 : vector<16x48xf32>
    %9 = arith.addf %5, %8 : vector<16x48xf32>
    %c0_6 = arith.constant 0 : index
    %c2 = arith.constant 2 : index
    %10 = memref.load %arg1[%c0_6, %c2] : memref<3x3xf32, #tpu.memory_space<smem>>
    %11 = vector.broadcast %10 : f32 to vector<16x48xf32>
    %12 = arith.mulf %2, %11 : vector<16x48xf32>
    %13 = arith.addf %9, %12 : vector<16x48xf32>
    %c0_7 = arith.constant 0 : index
    %14 = memref.load %arg2[%c0_7] : memref<3xf32, #tpu.memory_space<smem>>
    %15 = vector.broadcast %14 : f32 to vector<16x48xf32>
    %16 = arith.addf %13, %15 : vector<16x48xf32>
    %c0_8 = arith.constant 0 : index
    %c0_9 = arith.constant 0 : index
    %17 = vector.load %arg8[%c0_8, %c0_9] : memref<48x48xf32, #tpu.memory_space<vmem>>, vector<16x48xf32>
    tpu.vector_store %arg8[%c0_8, %c0_9], %16 {strides = array<i32>} : memref<48x48xf32, #tpu.memory_space<vmem>>, vector<16x48xf32>,
    %c1_10 = arith.constant 1 : index
    %c0_11 = arith.constant 0 : index
    %18 = memref.load %arg1[%c1_10, %c0_11] : memref<3x3xf32, #tpu.memory_space<smem>>
    %19 = vector.broadcast %18 : f32 to vector<16x48xf32>
    %20 = arith.mulf %0, %19 : vector<16x48xf32>
    %c1_12 = arith.constant 1 : index
    %c1_13 = arith.constant 1 : index
    %21 = memref.load %arg1[%c1_12, %c1_13] : memref<3x3xf32, #tpu.memory_space<smem>>
    %22 = vector.broadcast %21 : f32 to vector<16x48xf32>
    %23 = arith.mulf %1, %22 : vector<16x48xf32>
    %24 = arith.addf %20, %23 : vector<16x48xf32>
    %c1_14 = arith.constant 1 : index
    %c2_15 = arith.constant 2 : index
    %25 = memref.load %arg1[%c1_14, %c2_15] : memref<3x3xf32, #tpu.memory_space<smem>>
    %26 = vector.broadcast %25 : f32 to vector<16x48xf32>
    %27 = arith.mulf %2, %26 : vector<16x48xf32>
    %28 = arith.addf %24, %27 : vector<16x48xf32>
    %c1_16 = arith.constant 1 : index
    %29 = memref.load %arg2[%c1_16] : memref<3xf32, #tpu.memory_space<smem>>
    %30 = vector.broadcast %29 : f32 to vector<16x48xf32>
    %31 = arith.addf %28, %30 : vector<16x48xf32>
    %c16_17 = arith.constant 16 : index
    %c0_18 = arith.constant 0 : index
    %32 = vector.load %arg8[%c16_17, %c0_18] : memref<48x48xf32, #tpu.memory_space<vmem>>, vector<16x48xf32>
    tpu.vector_store %arg8[%c16_17, %c0_18], %31 {strides = array<i32>} : memref<48x48xf32, #tpu.memory_space<vmem>>, vector<16x48xf32>,
    %c2_19 = arith.constant 2 : index
    %c0_20 = arith.constant 0 : index
    %33 = memref.load %arg1[%c2_19, %c0_20] : memref<3x3xf32, #tpu.memory_space<smem>>
    %34 = vector.broadcast %33 : f32 to vector<16x48xf32>
    %35 = arith.mulf %0, %34 : vector<16x48xf32>
    %c2_21 = arith.constant 2 : index
    %c1_22 = arith.constant 1 : index
    %36 = memref.load %arg1[%c2_21, %c1_22] : memref<3x3xf32, #tpu.memory_space<smem>>
    %37 = vector.broadcast %36 : f32 to vector<16x48xf32>
    %38 = arith.mulf %1, %37 : vector<16x48xf32>
    %39 = arith.addf %35, %38 : vector<16x48xf32>
    %c2_23 = arith.constant 2 : index
    %c2_24 = arith.constant 2 : index
    %40 = memref.load %arg1[%c2_23, %c2_24] : memref<3x3xf32, #tpu.memory_space<smem>>
    %41 = vector.broadcast %40 : f32 to vector<16x48xf32>
    %42 = arith.mulf %2, %41 : vector<16x48xf32>
    %43 = arith.addf %39, %42 : vector<16x48xf32>
    %c2_25 = arith.constant 2 : index
    %44 = memref.load %arg2[%c2_25] : memref<3xf32, #tpu.memory_space<smem>>
    %45 = vector.broadcast %44 : f32 to vector<16x48xf32>
    %46 = arith.addf %43, %45 : vector<16x48xf32>
    %c32_26 = arith.constant 32 : index
    %c0_27 = arith.constant 0 : index
    %47 = vector.load %arg8[%c32_26, %c0_27] : memref<48x48xf32, #tpu.memory_space<vmem>>, vector<16x48xf32>
    tpu.vector_store %arg8[%c32_26, %c0_27], %46 {strides = array<i32>} : memref<48x48xf32, #tpu.memory_space<vmem>>, vector<16x48xf32>,
    %c0_28 = arith.constant 0 : index
    %c0_29 = arith.constant 0 : index
    %48 = vector.load %arg8[%c0_28, %c0_29] : memref<48x48xf32, #tpu.memory_space<vmem>>, vector<16x48xf32>
    %c16_30 = arith.constant 16 : index
    %c0_31 = arith.constant 0 : index
    %49 = vector.load %arg8[%c16_30, %c0_31] : memref<48x48xf32, #tpu.memory_space<vmem>>, vector<16x48xf32>
    %c32_32 = arith.constant 32 : index
    %c0_33 = arith.constant 0 : index
    %50 = vector.load %arg8[%c32_32, %c0_33] : memref<48x48xf32, #tpu.memory_space<vmem>>, vector<16x48xf32>
    %c0_34 = arith.constant 0 : index
    %c0_35 = arith.constant 0 : index
    %51 = memref.load %arg3[%c0_34, %c0_35] : memref<6x3xf32, #tpu.memory_space<smem>>
    %52 = vector.broadcast %51 : f32 to vector<16x48xf32>
    %53 = arith.mulf %48, %52 : vector<16x48xf32>
    %c0_36 = arith.constant 0 : index
    %c1_37 = arith.constant 1 : index
    %54 = memref.load %arg3[%c0_36, %c1_37] : memref<6x3xf32, #tpu.memory_space<smem>>
    %55 = vector.broadcast %54 : f32 to vector<16x48xf32>
    %56 = arith.mulf %49, %55 : vector<16x48xf32>
    %57 = arith.addf %53, %56 : vector<16x48xf32>
    %c0_38 = arith.constant 0 : index
    %c2_39 = arith.constant 2 : index
    %58 = memref.load %arg3[%c0_38, %c2_39] : memref<6x3xf32, #tpu.memory_space<smem>>
    %59 = vector.broadcast %58 : f32 to vector<16x48xf32>
    %60 = arith.mulf %50, %59 : vector<16x48xf32>
    %61 = arith.addf %57, %60 : vector<16x48xf32>
    %c0_40 = arith.constant 0 : index
    %62 = memref.load %arg4[%c0_40] : memref<6xf32, #tpu.memory_space<smem>>
    %63 = vector.broadcast %62 : f32 to vector<16x48xf32>
    %64 = arith.addf %61, %63 : vector<16x48xf32>
    %c0_41 = arith.constant 0 : index
    %c0_42 = arith.constant 0 : index
    %65 = vector.load %arg9[%c0_41, %c0_42] : memref<96x48xf32, #tpu.memory_space<vmem>>, vector<16x48xf32>
    tpu.vector_store %arg9[%c0_41, %c0_42], %64 {strides = array<i32>} : memref<96x48xf32, #tpu.memory_space<vmem>>, vector<16x48xf32>,
    %c1_43 = arith.constant 1 : index
    %c0_44 = arith.constant 0 : index
    %66 = memref.load %arg3[%c1_43, %c0_44] : memref<6x3xf32, #tpu.memory_space<smem>>
    %67 = vector.broadcast %66 : f32 to vector<16x48xf32>
    %68 = arith.mulf %48, %67 : vector<16x48xf32>
    %c1_45 = arith.constant 1 : index
    %c1_46 = arith.constant 1 : index
    %69 = memref.load %arg3[%c1_45, %c1_46] : memref<6x3xf32, #tpu.memory_space<smem>>
    %70 = vector.broadcast %69 : f32 to vector<16x48xf32>
    %71 = arith.mulf %49, %70 : vector<16x48xf32>
    %72 = arith.addf %68, %71 : vector<16x48xf32>
    %c1_47 = arith.constant 1 : index
    %c2_48 = arith.constant 2 : index
    %73 = memref.load %arg3[%c1_47, %c2_48] : memref<6x3xf32, #tpu.memory_space<smem>>
    %74 = vector.broadcast %73 : f32 to vector<16x48xf32>
    %75 = arith.mulf %50, %74 : vector<16x48xf32>
    %76 = arith.addf %72, %75 : vector<16x48xf32>
    %c1_49 = arith.constant 1 : index
    %77 = memref.load %arg4[%c1_49] : memref<6xf32, #tpu.memory_space<smem>>
    %78 = vector.broadcast %77 : f32 to vector<16x48xf32>
    %79 = arith.addf %76, %78 : vector<16x48xf32>
    %c16_50 = arith.constant 16 : index
    %c0_51 = arith.constant 0 : index
    %80 = vector.load %arg9[%c16_50, %c0_51] : memref<96x48xf32, #tpu.memory_space<vmem>>, vector<16x48xf32>
    tpu.vector_store %arg9[%c16_50, %c0_51], %79 {strides = array<i32>} : memref<96x48xf32, #tpu.memory_space<vmem>>, vector<16x48xf32>,
    %c2_52 = arith.constant 2 : index
    %c0_53 = arith.constant 0 : index
    %81 = memref.load %arg3[%c2_52, %c0_53] : memref<6x3xf32, #tpu.memory_space<smem>>
    %82 = vector.broadcast %81 : f32 to vector<16x48xf32>
    %83 = arith.mulf %48, %82 : vector<16x48xf32>
    %c2_54 = arith.constant 2 : index
    %c1_55 = arith.constant 1 : index
    %84 = memref.load %arg3[%c2_54, %c1_55] : memref<6x3xf32, #tpu.memory_space<smem>>
    %85 = vector.broadcast %84 : f32 to vector<16x48xf32>
    %86 = arith.mulf %49, %85 : vector<16x48xf32>
    %87 = arith.addf %83, %86 : vector<16x48xf32>
    %c2_56 = arith.constant 2 : index
    %c2_57 = arith.constant 2 : index
    %88 = memref.load %arg3[%c2_56, %c2_57] : memref<6x3xf32, #tpu.memory_space<smem>>
    %89 = vector.broadcast %88 : f32 to vector<16x48xf32>
    %90 = arith.mulf %50, %89 : vector<16x48xf32>
    %91 = arith.addf %87, %90 : vector<16x48xf32>
    %c2_58 = arith.constant 2 : index
    %92 = memref.load %arg4[%c2_58] : memref<6xf32, #tpu.memory_space<smem>>
    %93 = vector.broadcast %92 : f32 to vector<16x48xf32>
    %94 = arith.addf %91, %93 : vector<16x48xf32>
    %c32_59 = arith.constant 32 : index
    %c0_60 = arith.constant 0 : index
    %95 = vector.load %arg9[%c32_59, %c0_60] : memref<96x48xf32, #tpu.memory_space<vmem>>, vector<16x48xf32>
    tpu.vector_store %arg9[%c32_59, %c0_60], %94 {strides = array<i32>} : memref<96x48xf32, #tpu.memory_space<vmem>>, vector<16x48xf32>,
    %c3 = arith.constant 3 : index
    %c0_61 = arith.constant 0 : index
    %96 = memref.load %arg3[%c3, %c0_61] : memref<6x3xf32, #tpu.memory_space<smem>>
    %97 = vector.broadcast %96 : f32 to vector<16x48xf32>
    %98 = arith.mulf %48, %97 : vector<16x48xf32>
    %c3_62 = arith.constant 3 : index
    %c1_63 = arith.constant 1 : index
    %99 = memref.load %arg3[%c3_62, %c1_63] : memref<6x3xf32, #tpu.memory_space<smem>>
    %100 = vector.broadcast %99 : f32 to vector<16x48xf32>
    %101 = arith.mulf %49, %100 : vector<16x48xf32>
    %102 = arith.addf %98, %101 : vector<16x48xf32>
    %c3_64 = arith.constant 3 : index
    %c2_65 = arith.constant 2 : index
    %103 = memref.load %arg3[%c3_64, %c2_65] : memref<6x3xf32, #tpu.memory_space<smem>>
    %104 = vector.broadcast %103 : f32 to vector<16x48xf32>
    %105 = arith.mulf %50, %104 : vector<16x48xf32>
    %106 = arith.addf %102, %105 : vector<16x48xf32>
    %c3_66 = arith.constant 3 : index
    %107 = memref.load %arg4[%c3_66] : memref<6xf32, #tpu.memory_space<smem>>
    %108 = vector.broadcast %107 : f32 to vector<16x48xf32>
    %109 = arith.addf %106, %108 : vector<16x48xf32>
    %c48 = arith.constant 48 : index
    %c0_67 = arith.constant 0 : index
    %110 = vector.load %arg9[%c48, %c0_67] : memref<96x48xf32, #tpu.memory_space<vmem>>, vector<16x48xf32>
    tpu.vector_store %arg9[%c48, %c0_67], %109 {strides = array<i32>} : memref<96x48xf32, #tpu.memory_space<vmem>>, vector<16x48xf32>,
    %c4 = arith.constant 4 : index
    %c0_68 = arith.constant 0 : index
    %111 = memref.load %arg3[%c4, %c0_68] : memref<6x3xf32, #tpu.memory_space<smem>>
    %112 = vector.broadcast %111 : f32 to vector<16x48xf32>
    %113 = arith.mulf %48, %112 : vector<16x48xf32>
    %c4_69 = arith.constant 4 : index
    %c1_70 = arith.constant 1 : index
    %114 = memref.load %arg3[%c4_69, %c1_70] : memref<6x3xf32, #tpu.memory_space<smem>>
    %115 = vector.broadcast %114 : f32 to vector<16x48xf32>
    %116 = arith.mulf %49, %115 : vector<16x48xf32>
    %117 = arith.addf %113, %116 : vector<16x48xf32>
    %c4_71 = arith.constant 4 : index
    %c2_72 = arith.constant 2 : index
    %118 = memref.load %arg3[%c4_71, %c2_72] : memref<6x3xf32, #tpu.memory_space<smem>>
    %119 = vector.broadcast %118 : f32 to vector<16x48xf32>
    %120 = arith.mulf %50, %119 : vector<16x48xf32>
    %121 = arith.addf %117, %120 : vector<16x48xf32>
    %c4_73 = arith.constant 4 : index
    %122 = memref.load %arg4[%c4_73] : memref<6xf32, #tpu.memory_space<smem>>
    %123 = vector.broadcast %122 : f32 to vector<16x48xf32>
    %124 = arith.addf %121, %123 : vector<16x48xf32>
    %c64 = arith.constant 64 : index
    %c0_74 = arith.constant 0 : index
    %125 = vector.load %arg9[%c64, %c0_74] : memref<96x48xf32, #tpu.memory_space<vmem>>, vector<16x48xf32>
    tpu.vector_store %arg9[%c64, %c0_74], %124 {strides = array<i32>} : memref<96x48xf32, #tpu.memory_space<vmem>>, vector<16x48xf32>,
    %c5 = arith.constant 5 : index
    %c0_75 = arith.constant 0 : index
    %126 = memref.load %arg3[%c5, %c0_75] : memref<6x3xf32, #tpu.memory_space<smem>>
    %127 = vector.broadcast %126 : f32 to vector<16x48xf32>
    %128 = arith.mulf %48, %127 : vector<16x48xf32>
    %c5_76 = arith.constant 5 : index
    %c1_77 = arith.constant 1 : index
    %129 = memref.load %arg3[%c5_76, %c1_77] : memref<6x3xf32, #tpu.memory_space<smem>>
    %130 = vector.broadcast %129 : f32 to vector<16x48xf32>
    %131 = arith.mulf %49, %130 : vector<16x48xf32>
    %132 = arith.addf %128, %131 : vector<16x48xf32>
    %c5_78 = arith.constant 5 : index
    %c2_79 = arith.constant 2 : index
    %133 = memref.load %arg3[%c5_78, %c2_79] : memref<6x3xf32, #tpu.memory_space<smem>>
    %134 = vector.broadcast %133 : f32 to vector<16x48xf32>
    %135 = arith.mulf %50, %134 : vector<16x48xf32>
    %136 = arith.addf %132, %135 : vector<16x48xf32>
    %c5_80 = arith.constant 5 : index
    %137 = memref.load %arg4[%c5_80] : memref<6xf32, #tpu.memory_space<smem>>
    %138 = vector.broadcast %137 : f32 to vector<16x48xf32>
    %139 = arith.addf %136, %138 : vector<16x48xf32>
    %c80 = arith.constant 80 : index
    %c0_81 = arith.constant 0 : index
    %140 = vector.load %arg9[%c80, %c0_81] : memref<96x48xf32, #tpu.memory_space<vmem>>, vector<16x48xf32>
    tpu.vector_store %arg9[%c80, %c0_81], %139 {strides = array<i32>} : memref<96x48xf32, #tpu.memory_space<vmem>>, vector<16x48xf32>,
    %c0_82 = arith.constant 0 : index
    %c0_83 = arith.constant 0 : index
    %141 = vector.load %arg9[%c0_82, %c0_83] : memref<96x48xf32, #tpu.memory_space<vmem>>, vector<16x48xf32>
    %c16_84 = arith.constant 16 : index
    %c0_85 = arith.constant 0 : index
    %142 = vector.load %arg9[%c16_84, %c0_85] : memref<96x48xf32, #tpu.memory_space<vmem>>, vector<16x48xf32>
    %c32_86 = arith.constant 32 : index
    %c0_87 = arith.constant 0 : index
    %143 = vector.load %arg9[%c32_86, %c0_87] : memref<96x48xf32, #tpu.memory_space<vmem>>, vector<16x48xf32>
    %c48_88 = arith.constant 48 : index
    %c0_89 = arith.constant 0 : index
    %144 = vector.load %arg9[%c48_88, %c0_89] : memref<96x48xf32, #tpu.memory_space<vmem>>, vector<16x48xf32>
    %c64_90 = arith.constant 64 : index
    %c0_91 = arith.constant 0 : index
    %145 = vector.load %arg9[%c64_90, %c0_91] : memref<96x48xf32, #tpu.memory_space<vmem>>, vector<16x48xf32>
    %c80_92 = arith.constant 80 : index
    %c0_93 = arith.constant 0 : index
    %146 = vector.load %arg9[%c80_92, %c0_93] : memref<96x48xf32, #tpu.memory_space<vmem>>, vector<16x48xf32>
    %c0_94 = arith.constant 0 : index
    %c0_95 = arith.constant 0 : index
    %147 = memref.load %arg5[%c0_94, %c0_95] : memref<6x6xf32, #tpu.memory_space<smem>>
    %148 = vector.broadcast %147 : f32 to vector<16x48xf32>
    %149 = arith.mulf %141, %148 : vector<16x48xf32>
    %c0_96 = arith.constant 0 : index
    %c1_97 = arith.constant 1 : index
    %150 = memref.load %arg5[%c0_96, %c1_97] : memref<6x6xf32, #tpu.memory_space<smem>>
    %151 = vector.broadcast %150 : f32 to vector<16x48xf32>
    %152 = arith.mulf %142, %151 : vector<16x48xf32>
    %153 = arith.addf %149, %152 : vector<16x48xf32>
    %c0_98 = arith.constant 0 : index
    %c2_99 = arith.constant 2 : index
    %154 = memref.load %arg5[%c0_98, %c2_99] : memref<6x6xf32, #tpu.memory_space<smem>>
    %155 = vector.broadcast %154 : f32 to vector<16x48xf32>
    %156 = arith.mulf %143, %155 : vector<16x48xf32>
    %157 = arith.addf %153, %156 : vector<16x48xf32>
    %c0_100 = arith.constant 0 : index
    %c3_101 = arith.constant 3 : index
    %158 = memref.load %arg5[%c0_100, %c3_101] : memref<6x6xf32, #tpu.memory_space<smem>>
    %159 = vector.broadcast %158 : f32 to vector<16x48xf32>
    %160 = arith.mulf %144, %159 : vector<16x48xf32>
    %161 = arith.addf %157, %160 : vector<16x48xf32>
    %c0_102 = arith.constant 0 : index
    %c4_103 = arith.constant 4 : index
    %162 = memref.load %arg5[%c0_102, %c4_103] : memref<6x6xf32, #tpu.memory_space<smem>>
    %163 = vector.broadcast %162 : f32 to vector<16x48xf32>
    %164 = arith.mulf %145, %163 : vector<16x48xf32>
    %165 = arith.addf %161, %164 : vector<16x48xf32>
    %c0_104 = arith.constant 0 : index
    %c5_105 = arith.constant 5 : index
    %166 = memref.load %arg5[%c0_104, %c5_105] : memref<6x6xf32, #tpu.memory_space<smem>>
    %167 = vector.broadcast %166 : f32 to vector<16x48xf32>
    %168 = arith.mulf %146, %167 : vector<16x48xf32>
    %169 = arith.addf %165, %168 : vector<16x48xf32>
    %c0_106 = arith.constant 0 : index
    %170 = memref.load %arg6[%c0_106] : memref<6xf32, #tpu.memory_space<smem>>
    %171 = vector.broadcast %170 : f32 to vector<16x48xf32>
    %172 = arith.addf %169, %171 : vector<16x48xf32>
    %c0_107 = arith.constant 0 : index
    %c0_108 = arith.constant 0 : index
    %173 = vector.load %arg10[%c0_107, %c0_108] : memref<96x48xf32, #tpu.memory_space<vmem>>, vector<16x48xf32>
    tpu.vector_store %arg10[%c0_107, %c0_108], %172 {strides = array<i32>} : memref<96x48xf32, #tpu.memory_space<vmem>>, vector<16x48xf32>,
    %c1_109 = arith.constant 1 : index
    %c0_110 = arith.constant 0 : index
    %174 = memref.load %arg5[%c1_109, %c0_110] : memref<6x6xf32, #tpu.memory_space<smem>>
    %175 = vector.broadcast %174 : f32 to vector<16x48xf32>
    %176 = arith.mulf %141, %175 : vector<16x48xf32>
    %c1_111 = arith.constant 1 : index
    %c1_112 = arith.constant 1 : index
    %177 = memref.load %arg5[%c1_111, %c1_112] : memref<6x6xf32, #tpu.memory_space<smem>>
    %178 = vector.broadcast %177 : f32 to vector<16x48xf32>
    %179 = arith.mulf %142, %178 : vector<16x48xf32>
    %180 = arith.addf %176, %179 : vector<16x48xf32>
    %c1_113 = arith.constant 1 : index
    %c2_114 = arith.constant 2 : index
    %181 = memref.load %arg5[%c1_113, %c2_114] : memref<6x6xf32, #tpu.memory_space<smem>>
    %182 = vector.broadcast %181 : f32 to vector<16x48xf32>
    %183 = arith.mulf %143, %182 : vector<16x48xf32>
    %184 = arith.addf %180, %183 : vector<16x48xf32>
    %c1_115 = arith.constant 1 : index
    %c3_116 = arith.constant 3 : index
    %185 = memref.load %arg5[%c1_115, %c3_116] : memref<6x6xf32, #tpu.memory_space<smem>>
    %186 = vector.broadcast %185 : f32 to vector<16x48xf32>
    %187 = arith.mulf %144, %186 : vector<16x48xf32>
    %188 = arith.addf %184, %187 : vector<16x48xf32>
    %c1_117 = arith.constant 1 : index
    %c4_118 = arith.constant 4 : index
    %189 = memref.load %arg5[%c1_117, %c4_118] : memref<6x6xf32, #tpu.memory_space<smem>>
    %190 = vector.broadcast %189 : f32 to vector<16x48xf32>
    %191 = arith.mulf %145, %190 : vector<16x48xf32>
    %192 = arith.addf %188, %191 : vector<16x48xf32>
    %c1_119 = arith.constant 1 : index
    %c5_120 = arith.constant 5 : index
    %193 = memref.load %arg5[%c1_119, %c5_120] : memref<6x6xf32, #tpu.memory_space<smem>>
    %194 = vector.broadcast %193 : f32 to vector<16x48xf32>
    %195 = arith.mulf %146, %194 : vector<16x48xf32>
    %196 = arith.addf %192, %195 : vector<16x48xf32>
    %c1_121 = arith.constant 1 : index
    %197 = memref.load %arg6[%c1_121] : memref<6xf32, #tpu.memory_space<smem>>
    %198 = vector.broadcast %197 : f32 to vector<16x48xf32>
    %199 = arith.addf %196, %198 : vector<16x48xf32>
    %c16_122 = arith.constant 16 : index
    %c0_123 = arith.constant 0 : index
    %200 = vector.load %arg10[%c16_122, %c0_123] : memref<96x48xf32, #tpu.memory_space<vmem>>, vector<16x48xf32>
    tpu.vector_store %arg10[%c16_122, %c0_123], %199 {strides = array<i32>} : memref<96x48xf32, #tpu.memory_space<vmem>>, vector<16x48xf32>,
    %c2_124 = arith.constant 2 : index
    %c0_125 = arith.constant 0 : index
    %201 = memref.load %arg5[%c2_124, %c0_125] : memref<6x6xf32, #tpu.memory_space<smem>>
    %202 = vector.broadcast %201 : f32 to vector<16x48xf32>
    %203 = arith.mulf %141, %202 : vector<16x48xf32>
    %c2_126 = arith.constant 2 : index
    %c1_127 = arith.constant 1 : index
    %204 = memref.load %arg5[%c2_126, %c1_127] : memref<6x6xf32, #tpu.memory_space<smem>>
    %205 = vector.broadcast %204 : f32 to vector<16x48xf32>
    %206 = arith.mulf %142, %205 : vector<16x48xf32>
    %207 = arith.addf %203, %206 : vector<16x48xf32>
    %c2_128 = arith.constant 2 : index
    %c2_129 = arith.constant 2 : index
    %208 = memref.load %arg5[%c2_128, %c2_129] : memref<6x6xf32, #tpu.memory_space<smem>>
    %209 = vector.broadcast %208 : f32 to vector<16x48xf32>
    %210 = arith.mulf %143, %209 : vector<16x48xf32>
    %211 = arith.addf %207, %210 : vector<16x48xf32>
    %c2_130 = arith.constant 2 : index
    %c3_131 = arith.constant 3 : index
    %212 = memref.load %arg5[%c2_130, %c3_131] : memref<6x6xf32, #tpu.memory_space<smem>>
    %213 = vector.broadcast %212 : f32 to vector<16x48xf32>
    %214 = arith.mulf %144, %213 : vector<16x48xf32>
    %215 = arith.addf %211, %214 : vector<16x48xf32>
    %c2_132 = arith.constant 2 : index
    %c4_133 = arith.constant 4 : index
    %216 = memref.load %arg5[%c2_132, %c4_133] : memref<6x6xf32, #tpu.memory_space<smem>>
    %217 = vector.broadcast %216 : f32 to vector<16x48xf32>
    %218 = arith.mulf %145, %217 : vector<16x48xf32>
    %219 = arith.addf %215, %218 : vector<16x48xf32>
    %c2_134 = arith.constant 2 : index
    %c5_135 = arith.constant 5 : index
    %220 = memref.load %arg5[%c2_134, %c5_135] : memref<6x6xf32, #tpu.memory_space<smem>>
    %221 = vector.broadcast %220 : f32 to vector<16x48xf32>
    %222 = arith.mulf %146, %221 : vector<16x48xf32>
    %223 = arith.addf %219, %222 : vector<16x48xf32>
    %c2_136 = arith.constant 2 : index
    %224 = memref.load %arg6[%c2_136] : memref<6xf32, #tpu.memory_space<smem>>
    %225 = vector.broadcast %224 : f32 to vector<16x48xf32>
    %226 = arith.addf %223, %225 : vector<16x48xf32>
    %c32_137 = arith.constant 32 : index
    %c0_138 = arith.constant 0 : index
    %227 = vector.load %arg10[%c32_137, %c0_138] : memref<96x48xf32, #tpu.memory_space<vmem>>, vector<16x48xf32>
    tpu.vector_store %arg10[%c32_137, %c0_138], %226 {strides = array<i32>} : memref<96x48xf32, #tpu.memory_space<vmem>>, vector<16x48xf32>,
    %c3_139 = arith.constant 3 : index
    %c0_140 = arith.constant 0 : index
    %228 = memref.load %arg5[%c3_139, %c0_140] : memref<6x6xf32, #tpu.memory_space<smem>>
    %229 = vector.broadcast %228 : f32 to vector<16x48xf32>
    %230 = arith.mulf %141, %229 : vector<16x48xf32>
    %c3_141 = arith.constant 3 : index
    %c1_142 = arith.constant 1 : index
    %231 = memref.load %arg5[%c3_141, %c1_142] : memref<6x6xf32, #tpu.memory_space<smem>>
    %232 = vector.broadcast %231 : f32 to vector<16x48xf32>
    %233 = arith.mulf %142, %232 : vector<16x48xf32>
    %234 = arith.addf %230, %233 : vector<16x48xf32>
    %c3_143 = arith.constant 3 : index
    %c2_144 = arith.constant 2 : index
    %235 = memref.load %arg5[%c3_143, %c2_144] : memref<6x6xf32, #tpu.memory_space<smem>>
    %236 = vector.broadcast %235 : f32 to vector<16x48xf32>
    %237 = arith.mulf %143, %236 : vector<16x48xf32>
    %238 = arith.addf %234, %237 : vector<16x48xf32>
    %c3_145 = arith.constant 3 : index
    %c3_146 = arith.constant 3 : index
    %239 = memref.load %arg5[%c3_145, %c3_146] : memref<6x6xf32, #tpu.memory_space<smem>>
    %240 = vector.broadcast %239 : f32 to vector<16x48xf32>
    %241 = arith.mulf %144, %240 : vector<16x48xf32>
    %242 = arith.addf %238, %241 : vector<16x48xf32>
    %c3_147 = arith.constant 3 : index
    %c4_148 = arith.constant 4 : index
    %243 = memref.load %arg5[%c3_147, %c4_148] : memref<6x6xf32, #tpu.memory_space<smem>>
    %244 = vector.broadcast %243 : f32 to vector<16x48xf32>
    %245 = arith.mulf %145, %244 : vector<16x48xf32>
    %246 = arith.addf %242, %245 : vector<16x48xf32>
    %c3_149 = arith.constant 3 : index
    %c5_150 = arith.constant 5 : index
    %247 = memref.load %arg5[%c3_149, %c5_150] : memref<6x6xf32, #tpu.memory_space<smem>>
    %248 = vector.broadcast %247 : f32 to vector<16x48xf32>
    %249 = arith.mulf %146, %248 : vector<16x48xf32>
    %250 = arith.addf %246, %249 : vector<16x48xf32>
    %c3_151 = arith.constant 3 : index
    %251 = memref.load %arg6[%c3_151] : memref<6xf32, #tpu.memory_space<smem>>
    %252 = vector.broadcast %251 : f32 to vector<16x48xf32>
    %253 = arith.addf %250, %252 : vector<16x48xf32>
    %c48_152 = arith.constant 48 : index
    %c0_153 = arith.constant 0 : index
    %254 = vector.load %arg10[%c48_152, %c0_153] : memref<96x48xf32, #tpu.memory_space<vmem>>, vector<16x48xf32>
    tpu.vector_store %arg10[%c48_152, %c0_153], %253 {strides = array<i32>} : memref<96x48xf32, #tpu.memory_space<vmem>>, vector<16x48xf32>,
    %c4_154 = arith.constant 4 : index
    %c0_155 = arith.constant 0 : index
    %255 = memref.load %arg5[%c4_154, %c0_155] : memref<6x6xf32, #tpu.memory_space<smem>>
    %256 = vector.broadcast %255 : f32 to vector<16x48xf32>
    %257 = arith.mulf %141, %256 : vector<16x48xf32>
    %c4_156 = arith.constant 4 : index
    %c1_157 = arith.constant 1 : index
    %258 = memref.load %arg5[%c4_156, %c1_157] : memref<6x6xf32, #tpu.memory_space<smem>>
    %259 = vector.broadcast %258 : f32 to vector<16x48xf32>
    %260 = arith.mulf %142, %259 : vector<16x48xf32>
    %261 = arith.addf %257, %260 : vector<16x48xf32>
    %c4_158 = arith.constant 4 : index
    %c2_159 = arith.constant 2 : index
    %262 = memref.load %arg5[%c4_158, %c2_159] : memref<6x6xf32, #tpu.memory_space<smem>>
    %263 = vector.broadcast %262 : f32 to vector<16x48xf32>
    %264 = arith.mulf %143, %263 : vector<16x48xf32>
    %265 = arith.addf %261, %264 : vector<16x48xf32>
    %c4_160 = arith.constant 4 : index
    %c3_161 = arith.constant 3 : index
    %266 = memref.load %arg5[%c4_160, %c3_161] : memref<6x6xf32, #tpu.memory_space<smem>>
    %267 = vector.broadcast %266 : f32 to vector<16x48xf32>
    %268 = arith.mulf %144, %267 : vector<16x48xf32>
    %269 = arith.addf %265, %268 : vector<16x48xf32>
    %c4_162 = arith.constant 4 : index
    %c4_163 = arith.constant 4 : index
    %270 = memref.load %arg5[%c4_162, %c4_163] : memref<6x6xf32, #tpu.memory_space<smem>>
    %271 = vector.broadcast %270 : f32 to vector<16x48xf32>
    %272 = arith.mulf %145, %271 : vector<16x48xf32>
    %273 = arith.addf %269, %272 : vector<16x48xf32>
    %c4_164 = arith.constant 4 : index
    %c5_165 = arith.constant 5 : index
    %274 = memref.load %arg5[%c4_164, %c5_165] : memref<6x6xf32, #tpu.memory_space<smem>>
    %275 = vector.broadcast %274 : f32 to vector<16x48xf32>
    %276 = arith.mulf %146, %275 : vector<16x48xf32>
    %277 = arith.addf %273, %276 : vector<16x48xf32>
    %c4_166 = arith.constant 4 : index
    %278 = memref.load %arg6[%c4_166] : memref<6xf32, #tpu.memory_space<smem>>
    %279 = vector.broadcast %278 : f32 to vector<16x48xf32>
    %280 = arith.addf %277, %279 : vector<16x48xf32>
    %c64_167 = arith.constant 64 : index
    %c0_168 = arith.constant 0 : index
    %281 = vector.load %arg10[%c64_167, %c0_168] : memref<96x48xf32, #tpu.memory_space<vmem>>, vector<16x48xf32>
    tpu.vector_store %arg10[%c64_167, %c0_168], %280 {strides = array<i32>} : memref<96x48xf32, #tpu.memory_space<vmem>>, vector<16x48xf32>,
    %c5_169 = arith.constant 5 : index
    %c0_170 = arith.constant 0 : index
    %282 = memref.load %arg5[%c5_169, %c0_170] : memref<6x6xf32, #tpu.memory_space<smem>>
    %283 = vector.broadcast %282 : f32 to vector<16x48xf32>
    %284 = arith.mulf %141, %283 : vector<16x48xf32>
    %c5_171 = arith.constant 5 : index
    %c1_172 = arith.constant 1 : index
    %285 = memref.load %arg5[%c5_171, %c1_172] : memref<6x6xf32, #tpu.memory_space<smem>>
    %286 = vector.broadcast %285 : f32 to vector<16x48xf32>
    %287 = arith.mulf %142, %286 : vector<16x48xf32>
    %288 = arith.addf %284, %287 : vector<16x48xf32>
    %c5_173 = arith.constant 5 : index
    %c2_174 = arith.constant 2 : index
    %289 = memref.load %arg5[%c5_173, %c2_174] : memref<6x6xf32, #tpu.memory_space<smem>>
    %290 = vector.broadcast %289 : f32 to vector<16x48xf32>
    %291 = arith.mulf %143, %290 : vector<16x48xf32>
    %292 = arith.addf %288, %291 : vector<16x48xf32>
    %c5_175 = arith.constant 5 : index
    %c3_176 = arith.constant 3 : index
    %293 = memref.load %arg5[%c5_175, %c3_176] : memref<6x6xf32, #tpu.memory_space<smem>>
    %294 = vector.broadcast %293 : f32 to vector<16x48xf32>
    %295 = arith.mulf %144, %294 : vector<16x48xf32>
    %296 = arith.addf %292, %295 : vector<16x48xf32>
    %c5_177 = arith.constant 5 : index
    %c4_178 = arith.constant 4 : index
    %297 = memref.load %arg5[%c5_177, %c4_178] : memref<6x6xf32, #tpu.memory_space<smem>>
    %298 = vector.broadcast %297 : f32 to vector<16x48xf32>
    %299 = arith.mulf %145, %298 : vector<16x48xf32>
    %300 = arith.addf %296, %299 : vector<16x48xf32>
    %c5_179 = arith.constant 5 : index
    %c5_180 = arith.constant 5 : index
    %301 = memref.load %arg5[%c5_179, %c5_180] : memref<6x6xf32, #tpu.memory_space<smem>>
    %302 = vector.broadcast %301 : f32 to vector<16x48xf32>
    %303 = arith.mulf %146, %302 : vector<16x48xf32>
    %304 = arith.addf %300, %303 : vector<16x48xf32>
    %c5_181 = arith.constant 5 : index
    %305 = memref.load %arg6[%c5_181] : memref<6xf32, #tpu.memory_space<smem>>
    %306 = vector.broadcast %305 : f32 to vector<16x48xf32>
    %307 = arith.addf %304, %306 : vector<16x48xf32>
    %c80_182 = arith.constant 80 : index
    %c0_183 = arith.constant 0 : index
    %308 = vector.load %arg10[%c80_182, %c0_183] : memref<96x48xf32, #tpu.memory_space<vmem>>, vector<16x48xf32>
    tpu.vector_store %arg10[%c80_182, %c0_183], %307 {strides = array<i32>} : memref<96x48xf32, #tpu.memory_space<vmem>>, vector<16x48xf32>,
    %c0_184 = arith.constant 0 : index
    %c0_185 = arith.constant 0 : index
    %309 = vector.load %arg10[%c0_184, %c0_185] : memref<96x48xf32, #tpu.memory_space<vmem>>, vector<96x48xf32>
    %c0_186 = arith.constant 0 : index
    %c0_187 = arith.constant 0 : index
    %310 = vector.load %arg9[%c0_186, %c0_187] : memref<96x48xf32, #tpu.memory_space<vmem>>, vector<96x48xf32>
    %c0_188 = arith.constant 0 : index
    %c0_189 = arith.constant 0 : index
    %311 = vector.load %arg8[%c0_188, %c0_189] : memref<48x48xf32, #tpu.memory_space<vmem>>, vector<48x48xf32>
    %cst = arith.constant dense<0.000000e+00> : vector<96x48xf32>
    %312 = tpu.matmul %310, %311, %cst {dimension_numbers = #tpu.dot_dimension_numbers<[1], [0], [0], [1], [0, 0, 1, 1], [], []>} : vector<96x48xf32>, vector<48x48xf32>, vector<96x48xf32> -> vector<96x48xf32>
    %cst_190 = arith.constant 8.000000e+00 : f32
    %313 = vector.broadcast %cst_190 : f32 to vector<96x48xf32>
    %314 = arith.mulf %313, %312 : vector<96x48xf32>
    %315 = arith.addf %309, %314 : vector<96x48xf32>
    %c0_191 = arith.constant 0 : index
    %c0_192 = arith.constant 0 : index
    %316 = vector.load %arg9[%c0_191, %c0_192] : memref<96x48xf32, #tpu.memory_space<vmem>>, vector<96x48xf32>
    %c0_193 = arith.constant 0 : index
    %c0_194 = arith.constant 0 : index
    %317 = vector.load %arg7[%c0_193, %c0_194] : memref<192x48xf32, #tpu.memory_space<vmem>>, vector<96x48xf32>
    tpu.vector_store %arg7[%c0_193, %c0_194], %316 {strides = array<i32>} : memref<192x48xf32, #tpu.memory_space<vmem>>, vector<96x48xf32>,
    %c96 = arith.constant 96 : index
    %c0_195 = arith.constant 0 : index
    %318 = vector.load %arg7[%c96, %c0_195] : memref<192x48xf32, #tpu.memory_space<vmem>>, vector<96x48xf32>
    tpu.vector_store %arg7[%c96, %c0_195], %315 {strides = array<i32>} : memref<192x48xf32, #tpu.memory_space<vmem>>, vector<96x48xf32>,
    return
  }
}

</mosaic_0001>

<bundles_post_ra>
// kernel: tpu_custom_call.1
= control target key start
LH: loop header
LB: loop body
LE: loop exit
PB: predicated region body
PF: predicated region fallthrough
CT: control target
= control target key end

     0   :  { %12 = vsyncpa [#allocation6], 0  ;;  %s1724_s0 = inlined_call_operand.hbm [shape: f32[48,48], index: 0, kind: input, shape index: {}]   ;;  %s1725_s1 = inlined_call_operand.vmem [shape: f32[3,3], index: 1, kind: input, shape index: {}]   ;;  %s1726_s2 = inlined_call_operand.vmem [shape: f32[3], index: 2, kind: input, shape index: {}]   ;;  %s1727_s3 = inlined_call_operand.vmem [shape: f32[6,3], index: 3, kind: input, shape index: {}]   ;;  %s1728_s4 = inlined_call_operand.vmem [shape: f32[6], index: 4, kind: input, shape index: {}]   ;;  %s1729_s5 = inlined_call_operand.vmem [shape: f32[6,6], index: 5, kind: input, shape index: {}]   ;;  %s1730_s6 = inlined_call_operand.vmem [shape: f32[6], index: 6, kind: input, shape index: {}]   ;;  %s1731_s7 = inlined_call_operand.vmem [shape: f32[192,48], index: 7, kind: output, shape index: {}]  }
   0x1   :  { %13 = vsyncpa [#allocation7], 0 }
   0x2   :  { %14 = vsyncpa [#allocation10], 0 }
   0x3   :  { %15 = vsyncpa [#allocation13], 0  ;;  %s45_s26 = sshll.u32 %s1726_s2, 4  ;;  %s46_s26 = int_to_ptr.vmem [resolvable:$true] %s45_s26 }
   0x4   :  { %16 = vsyncpa [#allocation16], 0  ;;  %s65_s29 = sshll.u32 %s1728_s4, 4  ;;  %s975_s30 = scalar_lea.vmem %s46_s26, 16  ;;  %s66_s29 = int_to_ptr.vmem [resolvable:$true] %s65_s29 }
   0x5   :  { %p976_p0 = scmp.ne.s32.totalorder %s46_s26, %s975_s30  ;;  %p980_p1 = scmp.lt.s32.totalorder %s46_s26, %s46_s26 }
   0x6   :  { %p981_p2 = scmp.lt.s32.totalorder %s975_s30, %s975_s30 }
   0x8   :  { %p982_p3 = por %p981_p2, %p980_p1 }
   0xa   :  { %p983_p4 = pnand %p982_p3, %p976_p0 }
   0xc   :  { %986 = shalt.err (!%p983_p4)
}
   0xd   :  { %s1077_s8 = smov [#allocation9]   ;;  %s987_s9 = scalar_lea.vmem %s66_s29, 16 }
   0xe   :  { %48 = dma.vmem_to_smem %s46_s26, 16, %s1077_s8, [#allocation10]  }
   0xf   :  { %p988_p5 = scmp.ne.s32.totalorder %s66_s29, %s987_s9  ;;  %p992_p6 = scmp.lt.s32.totalorder %s66_s29, %s66_s29 }
  0x10   :  { %p993_p7 = scmp.lt.s32.totalorder %s987_s9, %s987_s9 }
  0x12   :  { %p994_p8 = por %p993_p7, %p992_p6 }
  0x14   :  { %p995_p9 = pnand %p994_p8, %p988_p5 }
  0x16   :  { %998 = shalt.err (!%p995_p9)
}
  0x17   :  { %s1078_s2 = smov [#allocation12]   ;;  %s1079_s4 = smov [#allocation5]  }
  0x18   :  { %68 = dma.vmem_to_smem %s66_s29, 16, %s1078_s2, [#allocation13]  }
  0x19   :  { %s22_s10 = sshll.u32 %s1079_s4, 4  ;;  %s35_s13 = sshll.u32 %s1725_s1, 4  ;;  %s23_s10 = int_to_ptr.vmem [resolvable:$true] %s22_s10  ;;  %s36_s13 = int_to_ptr.vmem [resolvable:$true] %s35_s13 }
  0x1a   :  { %s1007_s14 = scalar_lea.vmem %s23_s10, 768  ;;  %p1012_p11 = scmp.lt.s32.totalorder %s23_s10, %s23_s10 }
  0x1b   :  { %p1008_p10 = scmp.ne.s32.totalorder %s23_s10, %s1007_s14  ;;  %p1013_p12 = scmp.lt.s32.totalorder %s1007_s14, %s1007_s14 }
  0x1d   :  { %p1014_p13 = por %p1013_p12, %p1012_p11 }
  0x1f   :  { %p1015_p0 = pnand %p1014_p13, %p1008_p10 }
  0x21   :  { %1018 = shalt.err (!%p1015_p0)
}
  0x22   :  { %s1080_s15 = smov 128   ;;  %s1081_s16 = smov 8  }
  0x23   :  { %28 = dma.hbm_to_vmem [thread:$0]  %s1724_s0, 768, %s23_s10, [#allocation6], %s1080_s15, %s1080_s15, %s1081_s16  }
  0x24   :  { %s1019_s19 = scalar_lea.vmem %s36_s13, 64  ;;  %p1024_p2 = scmp.lt.s32.totalorder %s36_s13, %s36_s13 }
  0x25   :  { %p1020_p1 = scmp.ne.s32.totalorder %s36_s13, %s1019_s19  ;;  %p1025_p3 = scmp.lt.s32.totalorder %s1019_s19, %s1019_s19 }
  0x27   :  { %p1026_p4 = por %p1025_p3, %p1024_p2 }
  0x29   :  { %p1027_p5 = pnand %p1026_p4, %p1020_p1 }
  0x2b   :  { %1030 = shalt.err (!%p1027_p5)
}
  0x2c   :  { %s1082_s1 = smov [#allocation8]   ;;  %s55_s22 = sshll.u32 %s1727_s3, 4  ;;  %s56_s22 = int_to_ptr.vmem [resolvable:$true] %s55_s22 }
  0x2d   :  { %38 = dma.vmem_to_smem %s36_s13, 64, %s1082_s1, [#allocation7]  }
  0x2e   :  { %s75_s25 = sshll.u32 %s1729_s5, 4  ;;  %s1031_s0 = scalar_lea.vmem %s56_s22, 128  ;;  %s76_s25 = int_to_ptr.vmem [resolvable:$true] %s75_s25 }
  0x2f   :  { %p1032_p6 = scmp.ne.s32.totalorder %s56_s22, %s1031_s0  ;;  %p1036_p7 = scmp.lt.s32.totalorder %s56_s22, %s56_s22 }
  0x30   :  { %p1037_p8 = scmp.lt.s32.totalorder %s1031_s0, %s1031_s0 }
  0x32   :  { %p1038_p9 = por %p1037_p8, %p1036_p7 }
  0x34   :  { %p1039_p10 = pnand %p1038_p9, %p1032_p6 }
  0x36   :  { %1042 = shalt.err (!%p1039_p10)
}
  0x37   :  { %s1083_s26 = smov [#allocation11]   ;;  %s1043_s27 = scalar_lea.vmem %s76_s25, 128 }
  0x38   :  { %58 = dma.vmem_to_smem %s56_s22, 128, %s1083_s26, [#allocation10]  }
  0x39   :  { %p1044_p11 = scmp.ne.s32.totalorder %s76_s25, %s1043_s27  ;;  %p1048_p12 = scmp.lt.s32.totalorder %s76_s25, %s76_s25 }
  0x3a   :  { %p1049_p13 = scmp.lt.s32.totalorder %s1043_s27, %s1043_s27 }
  0x3c   :  { %p1050_p0 = por %p1049_p13, %p1048_p12 }
  0x3e   :  { %p1051_p1 = pnand %p1050_p0, %p1044_p11 }
  0x40   :  { %1054 = shalt.err (!%p1051_p1)
}
  0x41   :  { %s1084_s3 = smov [#allocation14]   ;;  %s85_s29 = sshll.u32 %s1730_s6, 4  ;;  %s86_s29 = int_to_ptr.vmem [resolvable:$true] %s85_s29 }
  0x42   :  { %78 = dma.vmem_to_smem %s76_s25, 128, %s1084_s3, [#allocation13]  }
  0x43   :  { %s1055_s30 = scalar_lea.vmem %s86_s29, 16  ;;  %p1060_p3 = scmp.lt.s32.totalorder %s86_s29, %s86_s29 }
  0x44   :  { %p1056_p2 = scmp.ne.s32.totalorder %s86_s29, %s1055_s30  ;;  %p1061_p4 = scmp.lt.s32.totalorder %s1055_s30, %s1055_s30 }
  0x46   :  { %p1062_p5 = por %p1061_p4, %p1060_p3 }
  0x48   :  { %p1063_p6 = pnand %p1062_p5, %p1056_p2 }
  0x4a   :  { %1066 = shalt.err (!%p1063_p6)
}
  0x4b   :  { %s1085_s8 = smov [#allocation15]  }
  0x4c   :  { %88 = dma.vmem_to_smem %s86_s29, 16, %s1085_s8, [#allocation16]  }
  0x4d   :  { %1067 = dma.done.wait [#allocation6], 768  }
  0x4e   :  { %1068 = vsyncadd [#allocation6], 4294966528 }
  0x4f   :  { %1069 = dma.done.wait [#allocation7], 64  }
  0x50   :  { %1070 = vsyncadd [#allocation7], 4294967232 }
  0x51   :  { %1071 = dma.done.wait [#allocation10], 144  }
  0x52   :  { %1072 = vsyncadd [#allocation10], 4294967152 }
  0x53   :  { %1073 = dma.done.wait [#allocation13], 144  }
  0x54   :  { %1074 = vsyncadd [#allocation13], 4294967152 }
  0x55   :  { %1075 = dma.done.wait [#allocation16], 16  }
  0x56   :  { %1076 = vsyncadd [#allocation16], 4294967280 }
  0x57   :  { %110 = sfence }
  0x58   :  { %s828_s6 = sld [smem:[#allocation8 + $0x100]]  ;;  %v112_v0 = vld [vmem:[#allocation5 + $0x8] sm:$0xff]  ;;  %v111_v2 = vld [vmem:[#allocation5] sm:$0xff]  ;;  %v114_v3 = vld [vmem:[#allocation5 + $0x18] sm:$0xff]  ;;  %vm137_vm0 = vcmask 392192  }
  0x59   :  { %s829_s9 = sld [smem:[#allocation8 + $0x101]]  ;;  %v113_v6 = vld [vmem:[#allocation5 + $0x10] sm:$0xff]  ;;  %v116_v8 = vld [vmem:[#allocation5 + $0x28] sm:$0xff]  ;;  %v115_v11 = vld [vmem:[#allocation5 + $0x20] sm:$0xff] }
  0x5a   :  { %s830_s2 = sld [smem:[#allocation8 + $0x102]] }
  0x5b   :  { %s1147_s4 = sld [smem:[#allocation9 + $0x2]] }
  0x5c   :  { %s824_s10 = sld [smem:[#allocation8 + $0x80]] }
  0x5d   :  { %s1149_s11 = sld [smem:[#allocation8 + $0x81]] }
  0x5e   :  { %v163_v1 = vstv %s828_s6  ;;  %s1151_s12 = sld [smem:[#allocation8 + $0x82]] }
  0x5f   :  { %v165_v4 = vmul.f32 %v163_v1, %v112_v0  ;;  %v167_v5 = vstv %s829_s9  ;;  %v164_v7 = vmul.f32 %v163_v1, %v111_v2  ;;  %s1153_s13 = sld [smem:[#allocation9 + $0x1]] }
  0x60   :  { %v169_v9 = vmul.f32 %v167_v5, %v114_v3  ;;  %v173_v10 = vstv %s830_s2  ;;  %v168_v12 = vmul.f32 %v167_v5, %v113_v6  ;;  %s1155_s14 = sld [smem:[#allocation8]] }
  0x61   :  { %v175_v13 = vmul.f32 %v173_v10, %v116_v8  ;;  %v174_v14 = vmul.f32 %v173_v10, %v115_v11  ;;  %s1157_s15 = sld [smem:[#allocation8 + $0x1]]  ;;  %v179_v18 = vstv %s1147_s4 }
  0x62   :  { %v171_v15 = vadd.f32 %v169_v9, %v165_v4  ;;  %v170_v16 = vadd.f32 %v168_v12, %v164_v7  ;;  %v141_v17 = vstv %s824_s10  ;;  %s1159_s16 = sld [smem:[#allocation8 + $0x2]] }
  0x63   :  { %v143_v19 = vmul.f32 %v141_v17, %v112_v0  ;;  %v145_v20 = vstv %s1149_s11  ;;  %v142_v21 = vmul.f32 %v141_v17, %v111_v2  ;;  %s1163_s17 = sld [smem:[#allocation9]] }
  0x64   :  { %v177_v22 = vadd.f32 %v175_v13, %v171_v15  ;;  %v176_v23 = vadd.f32 %v174_v14, %v170_v16  ;;  %v147_v24 = vmul.f32 %v145_v20, %v114_v3  ;;  %v151_v25 = vstv %s1151_s12  ;;  %s1166_s18 = sld [smem:[#allocation11]] }
  0x65   :  { %v153_v26 = vmul.f32 %v151_v25, %v116_v8  ;;  %v157_v27 = vstv %s1153_s13  ;;  %v146_v28 = vmul.f32 %v145_v20, %v113_v6  ;;  %v152_v29 = vmul.f32 %v151_v25, %v115_v11  ;;  %s1169_s19 = sld [smem:[#allocation11 + $0x1]] }
  0x66   :  { %v181_v30 = vadd.f32 %v179_v18, %v177_v22  ;;  %v180_v31 = vadd.f32 %v179_v18, %v176_v23  ;;  %v149_v32 = vadd.f32 %v147_v24, %v143_v19  ;;  %v118_v33 = vstv %s1155_s14  ;;  %s1172_s1 = sld [smem:[#allocation11 + $0x2]] }
  0x67   :  { %v148_v34 = vadd.f32 %v146_v28, %v142_v21  ;;  %v120_v35 = vmul.f32 %v118_v33, %v112_v0  ;;  %v122_v36 = vstv %s1157_s15  ;;  %v119_v37 = vmul.f32 %v118_v33, %v111_v2  ;;  %s1175_s20 = sld [smem:[#allocation12]] }
  0x68   :  { %183 = vst.msk [vmem:[#allocation2 + $0x28] sm:$0xff] %vm137_vm0, %v181_v30  ;;  %182 = vst.msk [vmem:[#allocation2 + $0x20] sm:$0xff] %vm137_vm0, %v180_v31  ;;  %v155_v38 = vadd.f32 %v153_v26, %v149_v32  ;;  %v124_v39 = vmul.f32 %v122_v36, %v114_v3  ;;  %v128_v40 = vstv %s1159_s16  ;;  %v123_v41 = vmul.f32 %v122_v36, %v113_v6  ;;  %s1180_s21 = sld [smem:[#allocation11 + $0x180]] }
  0x69   :  { %v154_v42 = vadd.f32 %v152_v29, %v148_v34  ;;  %v130_v43 = vmul.f32 %v128_v40, %v116_v8  ;;  %v129_v44 = vmul.f32 %v128_v40, %v115_v11  ;;  %s1182_s22 = sld [smem:[#allocation11 + $0x181]]  ;;  %v134_v49 = vstv %s1163_s17 }
  0x6a   :  { %v159_v45 = vadd.f32 %v157_v27, %v155_v38  ;;  %v126_v46 = vadd.f32 %v124_v39, %v120_v35  ;;  %v125_v47 = vadd.f32 %v123_v41, %v119_v37  ;;  %s1184_s23 = sld [smem:[#allocation11 + $0x182]]  ;;  %v191_v58 = vstv %s1166_s18 }
  0x6b   :  { %v158_v48 = vadd.f32 %v157_v27, %v154_v42  ;;  %s1187_s24 = sld [smem:[#allocation12 + $0x3]]  ;;  %v195_v59 = vstv %s1169_s19 }
  0x6c   :  { %161 = vst.msk [vmem:[#allocation2 + $0x18] sm:$0xff] %vm137_vm0, %v159_v45  ;;  %v132_v50 = vadd.f32 %v130_v43, %v126_v46  ;;  %v131_v51 = vadd.f32 %v129_v44, %v125_v47  ;;  %s1190_s25 = sld [smem:[#allocation11 + $0x80]]  ;;  %v201_v56 = vstv %s1172_s1 }
  0x6d   :  { %160 = vst.msk [vmem:[#allocation2 + $0x10] sm:$0xff] %vm137_vm0, %v158_v48  ;;  %s1193_s0 = sld [smem:[#allocation11 + $0x81]]  ;;  %v207_v60 = vstv %s1175_s20 }
  0x6e   :  { %v136_v52 = vadd.f32 %v134_v49, %v132_v50  ;;  %v135_v53 = vadd.f32 %v134_v49, %v131_v51  ;;  %s1195_s26 = sld [smem:[#allocation11 + $0x82]]  ;;  %v257_v1 = vstv %s1180_s21 }
  0x6f   :  { %v1197_v54 = vld [vmem:[#allocation2 + $0x28] sm:$0xff]  ;;  %s1199_s27 = sld [smem:[#allocation12 + $0x1]]  ;;  %v1203_v55 = vld [vmem:[#allocation2 + $0x20] sm:$0xff]  ;;  %v261_v61 = vstv %s1182_s22 }
  0x70   :  { %924 = vmatprep.subr.mxu0 %v1197_v54  ;;  %954 = vmatprep.subr.mxu1 %v1197_v54  ;;  %139 = vst.msk [vmem:[#allocation2 + $0x8] sm:$0xff] %vm137_vm0, %v136_v52  ;;  %138 = vst.msk [vmem:[#allocation2] sm:$0xff] %vm137_vm0, %v135_v53  ;;  %s1208_s3 = sld [smem:[#allocation11 + $0x200]]  ;;  %v267_v57 = vstv %s1184_s23  ;;  %v1228_v63 = vmul.f32 %v1203_v55, %v201_v56  ;;  %v1231_v0 = vmul.f32 %v1197_v54, %v201_v56 }
  0x71   :  { %925 = vmatpush3.msra.mxu0 %v1197_v54  ;;  %960 = vmatpush3.msra.mxu1 %v1197_v54  ;;  %s1213_s5 = sld [smem:[#allocation11 + $0x201]]  ;;  %v268_v4 = vmul.f32 %v1203_v55, %v267_v57  ;;  %v269_v5 = vmul.f32 %v1197_v54, %v267_v57  ;;  %v273_v6 = vstv %s1187_s24 }
  0x72   :  { %926 = vmatprep.subr.mxu0 %v1203_v55  ;;  %955 = vmatprep.subr.mxu1 %v1203_v55  ;;  %s1221_s28 = sld [smem:[#allocation11 + $0x202]]  ;;  %v213_v10 = vstv %s1190_s25 }
  0x73   :  { %927 = vmatpush3.msra.mxu0 %v1203_v55  ;;  %961 = vmatpush3.msra.mxu1 %v1203_v55  ;;  %v1225_v62 = vld [vmem:[#allocation2 + $0x18] sm:$0xff]  ;;  %v217_v2 = vstv %s1193_s0  ;;  %s1235_s29 = sld [smem:[#allocation12 + $0x4]] }
  0x74   :  { %928 = vmatprep.subr.mxu0 %v1225_v62  ;;  %956 = vmatprep.subr.mxu1 %v1225_v62  ;;  %v1239_v3 = vld [vmem:[#allocation2 + $0x10] sm:$0xff]  ;;  %v223_v7 = vstv %s1195_s26  ;;  %s1245_s30 = sld [smem:[#allocation11 + $0x100]]  ;;  %v197_v8 = vmul.f32 %v1225_v62, %v195_v59  ;;  %v263_v9 = vmul.f32 %v1225_v62, %v261_v61  ;;  %v219_v11 = vmul.f32 %v1225_v62, %v217_v2 }
  0x75   :  { %929 = vmatpush3.msra.mxu0 %v1225_v62  ;;  %962 = vmatpush3.msra.mxu1 %v1225_v62  ;;  %s1253_s8 = sld [smem:[#allocation11 + $0x101]]  ;;  %v196_v12 = vmul.f32 %v1239_v3, %v195_v59  ;;  %v262_v13 = vmul.f32 %v1239_v3, %v261_v61  ;;  %v218_v14 = vmul.f32 %v1239_v3, %v217_v2  ;;  %v229_v19 = vstv %s1199_s27 }
  0x76   :  { %930 = vmatprep.subr.mxu0 %v1239_v3  ;;  %957 = vmatprep.subr.mxu1 %v1239_v3  ;;  %v279_v15 = vstv %s1208_s3  ;;  %v224_v18 = vmul.f32 %v1203_v55, %v223_v7  ;;  %v225_v21 = vmul.f32 %v1197_v54, %v223_v7  ;;  %s1271_s6 = sld [smem:[#allocation11 + $0x102]] }
  0x77   :  { %931 = vmatpush3.msra.mxu0 %v1239_v3  ;;  %963 = vmatpush3.msra.mxu1 %v1239_v3  ;;  %v1263_v16 = vld [vmem:[#allocation2 + $0x8] sm:$0xff]  ;;  %v1265_v17 = vld [vmem:[#allocation2] sm:$0xff]  ;;  %v283_v20 = vstv %s1213_s5  ;;  %s1279_s9 = sld [smem:[#allocation12 + $0x2]] }
  0x78   :  { %932 = vmatprep.subr.mxu0 %v1263_v16  ;;  %958 = vmatprep.subr.mxu1 %v1263_v16  ;;  %v192_v22 = vmul.f32 %v1265_v17, %v191_v58  ;;  %v193_v23 = vmul.f32 %v1263_v16, %v191_v58  ;;  %v258_v24 = vmul.f32 %v1265_v17, %v257_v1  ;;  %v289_v25 = vstv %s1221_s28  ;;  %s1287_s2 = sld [smem:[#allocation11 + $0x280]] }
  0x79   :  { %933 = vmatpush3.msra.mxu0 %v1263_v16  ;;  %964 = vmatpush3.msra.mxu1 %v1263_v16  ;;  %v259_v26 = vmul.f32 %v1263_v16, %v257_v1  ;;  %v214_v27 = vmul.f32 %v1265_v17, %v213_v10  ;;  %v280_v28 = vmul.f32 %v1265_v17, %v279_v15  ;;  %v295_v29 = vstv %s1235_s29  ;;  %s1292_s4 = sld [smem:[#allocation11 + $0x281]] }
  0x7a   :  { %934 = vmatprep.subr.mxu0 %v1265_v17  ;;  %959 = vmatprep.subr.mxu1 %v1265_v17  ;;  %v198_v30 = vadd.f32 %v196_v12, %v192_v22  ;;  %v199_v31 = vadd.f32 %v197_v8, %v193_v23  ;;  %v264_v32 = vadd.f32 %v262_v13, %v258_v24  ;;  %v235_v33 = vstv %s1245_s30  ;;  %s1298_s10 = sld [smem:[#allocation11 + $0x282]] }
  0x7b   :  { %935 = vmatpush3.msra.mxu0 %v1265_v17  ;;  %965 = vmatpush3.msra.mxu1 %v1265_v17  ;;  %v265_v34 = vadd.f32 %v263_v9, %v259_v26  ;;  %v220_v35 = vadd.f32 %v218_v14, %v214_v27  ;;  %v284_v36 = vmul.f32 %v1239_v3, %v283_v20  ;;  %v239_v37 = vstv %s1253_s8  ;;  %s1315_s11 = sld [smem:[#allocation12 + $0x5]] }
  0x7c   :  { %v204_v38 = vadd.f32 %v1228_v63, %v198_v30  ;;  %v205_v39 = vadd.f32 %v1231_v0, %v199_v31  ;;  %v270_v40 = vadd.f32 %v268_v4, %v264_v32  ;;  %v290_v41 = vmul.f32 %v1203_v55, %v289_v25  ;;  %s1338_s12 = sld [smem:[#allocation14]] }
  0x7d   :  { %v271_v42 = vadd.f32 %v269_v5, %v265_v34  ;;  %v226_v43 = vadd.f32 %v224_v18, %v220_v35  ;;  %v286_v44 = vadd.f32 %v284_v36, %v280_v28  ;;  %v215_v45 = vmul.f32 %v1263_v16, %v213_v10  ;;  %s1342_s13 = sld [smem:[#allocation14 + $0x1]] }
  0x7e   :  { %v208_v46 = vadd.f32 %v207_v60, %v204_v38  ;;  %v209_v47 = vadd.f32 %v207_v60, %v205_v39  ;;  %v274_v48 = vadd.f32 %v273_v6, %v270_v40  ;;  %v281_v49 = vmul.f32 %v1263_v16, %v279_v15  ;;  %s1399_s23 = sld [smem:[#allocation14 + $0x2]] }
  0x7f   :  { %v275_v50 = vadd.f32 %v273_v6, %v271_v42  ;;  %v230_v51 = vadd.f32 %v229_v19, %v226_v43  ;;  %v292_v52 = vadd.f32 %v290_v41, %v286_v44  ;;  %v221_v53 = vadd.f32 %v219_v11, %v215_v45  ;;  %s1405_s24 = sld [smem:[#allocation14 + $0x3]] }
  0x80   :  { %210 = vst.msk [vmem:[#allocation3] sm:$0xff] %vm137_vm0, %v208_v46  ;;  %211 = vst.msk [vmem:[#allocation3 + $0x8] sm:$0xff] %vm137_vm0, %v209_v47  ;;  %v285_v56 = vmul.f32 %v1225_v62, %v283_v20  ;;  %v291_v57 = vmul.f32 %v1197_v54, %v289_v25  ;;  %v236_v58 = vmul.f32 %v1265_v17, %v235_v33  ;;  %v245_v63 = vstv %s1271_s6  ;;  %s1419_s26 = sld [smem:[#allocation14 + $0x4]] }
  0x81   :  { %276 = vst.msk [vmem:[#allocation3 + $0x30] sm:$0xff] %vm137_vm0, %v274_v48  ;;  %v240_v59 = vmul.f32 %v1239_v3, %v239_v37  ;;  %277 = vst.msk [vmem:[#allocation3 + $0x38] sm:$0xff] %vm137_vm0, %v275_v50  ;;  %v296_v60 = vadd.f32 %v295_v29, %v292_v52  ;;  %v227_v61 = vadd.f32 %v225_v21, %v221_v53  ;;  %v251_v0 = vstv %s1279_s9  ;;  %s1429_s5 = sld [smem:[#allocation14 + $0x5]] }
  0x82   :  { %232 = vst.msk [vmem:[#allocation3 + $0x10] sm:$0xff] %vm137_vm0, %v230_v51  ;;  %v287_v1 = vadd.f32 %v285_v56, %v281_v49  ;;  %v246_v4 = vmul.f32 %v1203_v55, %v245_v63  ;;  %v301_v5 = vstv %s1287_s2  ;;  %v305_v8 = vstv %s1292_s4  ;;  %s1466_s2 = sld [smem:[#allocation15]] }
  0x83   :  { %v242_v2 = vadd.f32 %v240_v59, %v236_v58  ;;  %298 = vst.msk [vmem:[#allocation3 + $0x40] sm:$0xff] %vm137_vm0, %v296_v60  ;;  %v231_v6 = vadd.f32 %v229_v19, %v227_v61  ;;  %v302_v7 = vmul.f32 %v1265_v17, %v301_v5  ;;  %v311_v9 = vstv %s1298_s10  ;;  %s874_s14 = sld [smem:[#allocation14 + $0x181]] }
  0x84   :  { %v293_v10 = vadd.f32 %v291_v57, %v287_v1  ;;  %v306_v12 = vmul.f32 %v1239_v3, %v305_v8  ;;  %v312_v13 = vmul.f32 %v1203_v55, %v311_v9  ;;  %v237_v14 = vmul.f32 %v1263_v16, %v235_v33  ;;  %s875_s15 = sld [smem:[#allocation14 + $0x182]] }
  0x85   :  { %v248_v11 = vadd.f32 %v246_v4, %v242_v2  ;;  %233 = vst.msk [vmem:[#allocation3 + $0x18] sm:$0xff] %vm137_vm0, %v231_v6  ;;  %v241_v15 = vmul.f32 %v1225_v62, %v239_v37  ;;  %v247_v17 = vmul.f32 %v1197_v54, %v245_v63  ;;  %v303_v21 = vmul.f32 %v1263_v16, %v301_v5  ;;  %s1497_s16 = sld [smem:[#allocation14 + $0x183]] }
  0x86   :  { %v297_v18 = vadd.f32 %v295_v29, %v293_v10  ;;  %v308_v20 = vadd.f32 %v306_v12, %v302_v7  ;;  %v317_v23 = vstv %s1315_s11  ;;  %v307_v25 = vmul.f32 %v1225_v62, %v305_v8  ;;  %s1499_s17 = sld [smem:[#allocation14 + $0x80]] }
  0x87   :  { %v252_v19 = vadd.f32 %v251_v0, %v248_v11  ;;  %v1351_v22 = vld [vmem:[#allocation3] sm:$0xff]  ;;  %v1355_v55 = vld [vmem:[#allocation3 + $0x8] sm:$0xff]  ;;  %v243_v24 = vadd.f32 %v241_v15, %v237_v14  ;;  %v313_v26 = vmul.f32 %v1197_v54, %v311_v9  ;;  %v335_v34 = vstv %s1338_s12  ;;  %s1501_s18 = sld [smem:[#allocation14 + $0x184]] }
  0x88   :  { %v1353_v3 = vld [vmem:[#allocation3 + $0x30] sm:$0xff]  ;;  %936 = vmatprep.mubr.msk.f32.mxu0 %vm137_vm0, %v1351_v22  ;;  %789 = vst.msk [vmem:[%s1731_s7] sm:$0xff] %vm137_vm0, %v1351_v22  ;;  %790 = vst.msk [vmem:[%s1731_s7 + $0x8] sm:$0xff] %vm137_vm0, %v1355_v55  ;;  %v1379_v54 = vld [vmem:[#allocation3 + $0x38] sm:$0xff]  ;;  %v314_v16 = vadd.f32 %v312_v13, %v308_v20  ;;  %v309_v28 = vadd.f32 %v307_v25, %v303_v21  ;;  %v339_v35 = vstv %s1342_s13  ;;  %v345_v41 = vstv %s1399_s23  ;;  %s873_s13 = sld [smem:[#allocation14 + $0x180]] }
  0x89   :  { %945 = vmatprep.mubr.msk.f32.mxu1 %vm137_vm0, %v1353_v3  ;;  %795 = vst.msk [vmem:[%s1731_s7 + $0x30] sm:$0xff] %vm137_vm0, %v1353_v3  ;;  %v1381_v62 = vld [vmem:[#allocation3 + $0x10] sm:$0xff]  ;;  %299 = vst.msk [vmem:[#allocation3 + $0x48] sm:$0xff] %vm137_vm0, %v297_v18  ;;  %937 = vmatmul.mubr.msk.f32.vlgmr.msra.gmra.mxu0 %vm137_vm0, %v1355_v55  ;;  %v249_v27 = vadd.f32 %v247_v17, %v243_v24  ;;  %v337_v39 = vmul.f32 %v1355_v55, %v335_v34  ;;  %v351_v42 = vstv %s1405_s24  ;;  %s1504_s19 = sld [smem:[#allocation14 + $0x81]] }
  0x8a   :  { %254 = vst.msk [vmem:[#allocation3 + $0x20] sm:$0xff] %vm137_vm0, %v252_v19  ;;  %946 = vmatmul.mubr.msk.f32.vlgmr.msra.gmra.mxu1 %vm137_vm0, %v1379_v54  ;;  %796 = vst.msk [vmem:[%s1731_s7 + $0x38] sm:$0xff] %vm137_vm0, %v1379_v54  ;;  %939 = vmatprep.mubr.msk.f32.mxu0 %vm137_vm0, %v1381_v62  ;;  %v1403_v29 = vld [vmem:[#allocation3 + $0x40] sm:$0xff]  ;;  %v318_v30 = vadd.f32 %v317_v23, %v314_v16  ;;  %v315_v32 = vadd.f32 %v313_v26, %v309_v28  ;;  %v357_v46 = vstv %s1419_s26  ;;  %s1507_s1 = sld [smem:[#allocation14 + $0x185]] }
  0x8b   :  { %791 = vst.msk [vmem:[%s1731_s7 + $0x10] sm:$0xff] %vm137_vm0, %v1381_v62  ;;  %948 = vmatprep.mubr.msk.f32.mxu1 %vm137_vm0, %v1403_v29  ;;  %797 = vst.msk [vmem:[%s1731_s7 + $0x40] sm:$0xff] %vm137_vm0, %v1403_v29  ;;  %v253_v31 = vadd.f32 %v251_v0, %v249_v27  ;;  %v353_v48 = vmul.f32 %v1379_v54, %v351_v42  ;;  %v363_v50 = vstv %s1429_s5  ;;  %v369_v58 = vstv %s1466_s2  ;;  %s1513_s20 = sld [smem:[#allocation14 + $0x82]] }
  0x8c   :  { %v1414_v33 = vld [vmem:[#allocation3 + $0x18] sm:$0xff]  ;;  %320 = vst.msk [vmem:[#allocation3 + $0x50] sm:$0xff] %vm137_vm0, %v318_v30  ;;  %v319_v36 = vadd.f32 %v317_v23, %v315_v32  ;;  %v459_v0 = vstv %s874_s14  ;;  %v465_v2 = vstv %s875_s15  ;;  %v336_v5 = vmul.f32 %v1351_v22, %v335_v34  ;;  %s1517_s21 = sld [smem:[#allocation14 + $0x83]] }
  0x8d   :  { %940 = vmatmul.mubr.msk.f32.gmra.mxu0 %vm137_vm0, %v1414_v33  ;;  %792 = vst.msk [vmem:[%s1731_s7 + $0x18] sm:$0xff] %vm137_vm0, %v1414_v33  ;;  %255 = vst.msk [vmem:[#allocation3 + $0x28] sm:$0xff] %vm137_vm0, %v253_v31  ;;  %v341_v40 = vmul.f32 %v1414_v33, %v339_v35  ;;  %v461_v1 = vmul.f32 %v1414_v33, %v459_v0  ;;  %v340_v6 = vmul.f32 %v1381_v62, %v339_v35  ;;  %s1522_s22 = sld [smem:[#allocation14 + $0x84]] }
  0x8e   :  { %321 = vst.msk [vmem:[#allocation3 + $0x58] sm:$0xff] %vm137_vm0, %v319_v36  ;;  %v455_v61 = vstv %s873_s13  ;;  %v471_v9 = vstv %s1497_s16  ;;  %v460_v10 = vmul.f32 %v1381_v62, %v459_v0  ;;  %v477_v17 = vstv %s1501_s18  ;;  %s1525_s23 = sld [smem:[#allocation15 + $0x3]] }
  0x8f   :  { %v343_v44 = vadd.f32 %v341_v40, %v337_v39  ;;  %v457_v63 = vmul.f32 %v1355_v55, %v455_v61  ;;  %v456_v7 = vmul.f32 %v1351_v22, %v455_v61  ;;  %v473_v11 = vmul.f32 %v1379_v54, %v471_v9  ;;  %s1531_s24 = sld [smem:[#allocation14 + $0x85]] }
  0x90   :  { %v1431_v37 = vld [vmem:[#allocation3 + $0x48] sm:$0xff]  ;;  %v342_v12 = vadd.f32 %v340_v6, %v336_v5  ;;  %v375_v19 = vstv %s1499_s17  ;;  %v352_v23 = vmul.f32 %v1353_v3, %v351_v42  ;;  %v472_v24 = vmul.f32 %v1353_v3, %v471_v9  ;;  %s1535_s25 = sld [smem:[#allocation14 + $0x200]] }
  0x91   :  { %v1433_v38 = vld [vmem:[#allocation3 + $0x20] sm:$0xff]  ;;  %949 = vmatmul.mubr.msk.f32.gmra.mxu1 %vm137_vm0, %v1431_v37  ;;  %798 = vst.msk [vmem:[%s1731_s7 + $0x48] sm:$0xff] %vm137_vm0, %v1431_v37  ;;  %v359_v52 = vmul.f32 %v1431_v37, %v357_v46  ;;  %v463_v8 = vadd.f32 %v461_v1, %v457_v63  ;;  %v462_v18 = vadd.f32 %v460_v10, %v456_v7  ;;  %v483_v26 = vstv %s1507_s1  ;;  %s1542_s0 = sld [smem:[#allocation14 + $0x201]] }
  0x92   :  { %942 = vmatprep.mubr.msk.f32.mxu0 %vm137_vm0, %v1433_v38  ;;  %793 = vst.msk [vmem:[%s1731_s7 + $0x20] sm:$0xff] %vm137_vm0, %v1433_v38  ;;  %v346_v13 = vmul.f32 %v1433_v38, %v345_v41  ;;  %v466_v14 = vmul.f32 %v1433_v38, %v465_v2  ;;  %v479_v20 = vmul.f32 %v1431_v37, %v477_v17  ;;  %v379_v36 = vstv %s1504_s19  ;;  %s1546_s27 = sld [smem:[#allocation15 + $0x1]] }
  0x93   :  { %v1454_v43 = vld [vmem:[#allocation3 + $0x50] sm:$0xff]  ;;  %v377_v27 = vmul.f32 %v1355_v55, %v375_v19  ;;  %v358_v31 = vmul.f32 %v1403_v29, %v357_v46  ;;  %v478_v32 = vmul.f32 %v1403_v29, %v477_v17  ;;  %v385_v39 = vstv %s1513_s20  ;;  %s1553_s26 = sld [smem:[#allocation14 + $0x202]] }
  0x94   :  { %951 = vmatprep.mubr.msk.f32.mxu1 %vm137_vm0, %v1454_v43  ;;  %799 = vst.msk [vmem:[%s1731_s7 + $0x50] sm:$0xff] %vm137_vm0, %v1454_v43  ;;  %v1463_v45 = vld [vmem:[#allocation3 + $0x28] sm:$0xff]  ;;  %v348_v21 = vadd.f32 %v346_v13, %v342_v12  ;;  %v468_v16 = vadd.f32 %v466_v14, %v462_v18  ;;  %v484_v42 = vmul.f32 %v1454_v43, %v483_v26  ;;  %s1557_s3 = sld [smem:[#allocation14 + $0x203]] }
  0x95   :  { %943 = vmatmul.mubr.msk.f32.gmra.mxu0 %vm137_vm0, %v1463_v45  ;;  %794 = vst.msk [vmem:[%s1731_s7 + $0x28] sm:$0xff] %vm137_vm0, %v1463_v45  ;;  %v347_v47 = vmul.f32 %v1463_v45, %v345_v41  ;;  %v1477_v49 = vld [vmem:[#allocation3 + $0x58] sm:$0xff]  ;;  %v467_v4 = vmul.f32 %v1463_v45, %v465_v2  ;;  %v364_v41 = vmul.f32 %v1454_v43, %v363_v50  ;;  %s1561_s5 = sld [smem:[#allocation14 + $0x204]]  ;;  %v403_v1 = vstv %s1531_s24 }
  0x96   :  { %952 = vmatmul.mubr.msk.f32.gmra.mxu1 %vm137_vm0, %v1477_v49  ;;  %800 = vst.msk [vmem:[%s1731_s7 + $0x58] sm:$0xff] %vm137_vm0, %v1477_v49  ;;  %v365_v56 = vmul.f32 %v1477_v49, %v363_v50  ;;  %v485_v28 = vmul.f32 %v1477_v49, %v483_v26  ;;  %v354_v30 = vadd.f32 %v352_v23, %v348_v21  ;;  %v397_v50 = vstv %s1522_s22  ;;  %s1565_s28 = sld [smem:[#allocation14 + $0x205]] }
  0x97   :  { %v349_v51 = vadd.f32 %v347_v47, %v343_v44  ;;  %v469_v15 = vadd.f32 %v467_v4, %v463_v8  ;;  %v474_v35 = vadd.f32 %v472_v24, %v468_v16  ;;  %v381_v44 = vmul.f32 %v1414_v33, %v379_v36  ;;  %s1571_s29 = sld [smem:[#allocation15 + $0x4]] }
  0x98   :  { %v360_v40 = vadd.f32 %v358_v31, %v354_v30  ;;  %v489_v47 = vstv %s1525_s23  ;;  %v399_v61 = vmul.f32 %v1431_v37, %v397_v50  ;;  %v495_v2 = vstv %s1535_s25  ;;  %s1576_s30 = sld [smem:[#allocation14 + $0x100]] }
  0x99   :  { %v355_v53 = vadd.f32 %v353_v48, %v349_v51  ;;  %v475_v25 = vadd.f32 %v473_v11, %v469_v15  ;;  %v480_v48 = vadd.f32 %v478_v32, %v474_v35  ;;  %v387_v51 = vmul.f32 %v1463_v45, %v385_v39  ;;  %s1582_s8 = sld [smem:[#allocation14 + $0x101]] }
  0x9a   :  { %v405_v5 = vmul.f32 %v1477_v49, %v403_v1  ;;  %v497_v6 = vmul.f32 %v1355_v55, %v495_v2  ;;  %v499_v7 = vstv %s1542_s0  ;;  %v505_v8 = vstv %s1553_s26  ;;  %s1589_s6 = sld [smem:[#allocation14 + $0x102]] }
  0x9b   :  { %v361_v57 = vadd.f32 %v359_v52, %v355_v53  ;;  %v481_v34 = vadd.f32 %v479_v20, %v475_v25  ;;  %v366_v52 = vadd.f32 %v364_v41, %v360_v40  ;;  %v383_v53 = vadd.f32 %v381_v44, %v377_v27  ;;  %s1594_s9 = sld [smem:[#allocation14 + $0x103]] }
  0x9c   :  { %v376_v9 = vmul.f32 %v1351_v22, %v375_v19  ;;  %v501_v10 = vmul.f32 %v1414_v33, %v499_v7  ;;  %v507_v11 = vmul.f32 %v1463_v45, %v505_v8  ;;  %v511_v12 = vstv %s1557_s3  ;;  %s1598_s2 = sld [smem:[#allocation14 + $0x104]] }
  0x9d   :  { %v367_v59 = vadd.f32 %v365_v56, %v361_v57  ;;  %v487_v46 = vadd.f32 %v485_v28, %v481_v34  ;;  %v391_v56 = vstv %s1517_s21  ;;  %v370_v63 = vadd.f32 %v369_v58, %v366_v52  ;;  %s1603_s4 = sld [smem:[#allocation14 + $0x105]] }
  0x9e   :  { %v389_v0 = vadd.f32 %v387_v51, %v383_v53  ;;  %v380_v13 = vmul.f32 %v1381_v62, %v379_v36  ;;  %v409_v15 = vstv %s1546_s27  ;;  %v517_v17 = vstv %s1561_s5  ;;  %s1607_s10 = sld [smem:[#allocation15 + $0x2]] }
  0x9f   :  { %v371_v60 = vadd.f32 %v369_v58, %v367_v59  ;;  %v491_v57 = vadd.f32 %v489_v47, %v487_v46  ;;  %v486_v59 = vadd.f32 %v484_v42, %v480_v48  ;;  %372 = vst.msk [vmem:[#allocation4] sm:$0xff] %vm137_vm0, %v370_v63  ;;  %v386_v18 = vmul.f32 %v1433_v38, %v385_v39  ;;  %s1612_s11 = sld [smem:[#allocation14 + $0x280]] }
  0xa0   :  { %v503_v19 = vadd.f32 %v501_v10, %v497_v6  ;;  %v513_v20 = vmul.f32 %v1379_v54, %v511_v12  ;;  %v523_v21 = vstv %s1565_s28  ;;  %v382_v23 = vadd.f32 %v380_v13, %v376_v9  ;;  %s1616_s12 = sld [smem:[#allocation14 + $0x281]] }
  0xa1   :  { %373 = vst.msk [vmem:[#allocation4 + $0x8] sm:$0xff] %vm137_vm0, %v371_v60  ;;  %v393_v60 = vmul.f32 %v1379_v54, %v391_v56  ;;  %493 = vst.msk [vmem:[#allocation4 + $0x38] sm:$0xff] %vm137_vm0, %v491_v57  ;;  %v490_v4 = vadd.f32 %v489_v47, %v486_v59  ;;  %v519_v25 = vmul.f32 %v1431_v37, %v517_v17  ;;  %v529_v28 = vstv %s1571_s29  ;;  %s1622_s13 = sld [smem:[#allocation14 + $0x282]] }
  0xa2   :  { %v525_v26 = vmul.f32 %v1477_v49, %v523_v21  ;;  %v392_v16 = vmul.f32 %v1353_v3, %v391_v56  ;;  %v509_v27 = vadd.f32 %v507_v11, %v503_v19  ;;  %v388_v30 = vadd.f32 %v386_v18, %v382_v23  ;;  %s1626_s14 = sld [smem:[#allocation14 + $0x283]] }
  0xa3   :  { %v395_v58 = vadd.f32 %v393_v60, %v389_v0  ;;  %492 = vst.msk [vmem:[#allocation4 + $0x30] sm:$0xff] %vm137_vm0, %v490_v4  ;;  %v398_v31 = vmul.f32 %v1403_v29, %v397_v50  ;;  %v496_v34 = vmul.f32 %v1351_v22, %v495_v2  ;;  %v500_v35 = vmul.f32 %v1381_v62, %v499_v7  ;;  %s1631_s15 = sld [smem:[#allocation14 + $0x284]] }
  0xa4   :  { %v506_v36 = vmul.f32 %v1433_v38, %v505_v8  ;;  %v515_v39 = vadd.f32 %v513_v20, %v509_v27  ;;  %v394_v40 = vadd.f32 %v392_v16, %v388_v30  ;;  %v404_v41 = vmul.f32 %v1454_v43, %v403_v1  ;;  %s1634_s16 = sld [smem:[#allocation14 + $0x285]] }
  0xa5   :  { %v401_v14 = vadd.f32 %v399_v61, %v395_v58  ;;  %v512_v42 = vmul.f32 %v1353_v3, %v511_v12  ;;  %v502_v44 = vadd.f32 %v500_v35, %v496_v34  ;;  %v518_v46 = vmul.f32 %v1403_v29, %v517_v17  ;;  %s1651_s17 = sld [smem:[#allocation15 + $0x5]] }
  0xa6   :  { %v415_v47 = vstv %s1576_s30  ;;  %v419_v48 = vstv %s1582_s8  ;;  %v521_v51 = vadd.f32 %v519_v25, %v515_v39  ;;  %v400_v52 = vadd.f32 %v398_v31, %v394_v40 }
  0xa7   :  { %v407_v24 = vadd.f32 %v405_v5, %v401_v14  ;;  %v417_v53 = vmul.f32 %v1355_v55, %v415_v47  ;;  %v421_v56 = vmul.f32 %v1414_v33, %v419_v48  ;;  %v508_v50 = vadd.f32 %v506_v36, %v502_v44 }
  0xa8   :  { %v425_v57 = vstv %s1589_s6  ;;  %v431_v59 = vstv %s1594_s9  ;;  %v437_v60 = vstv %s1598_s2  ;;  %v527_v61 = vadd.f32 %v525_v26, %v521_v51 }
  0xa9   :  { %v411_v32 = vadd.f32 %v409_v15, %v407_v24  ;;  %v406_v63 = vadd.f32 %v404_v41, %v400_v52  ;;  %v423_v0 = vadd.f32 %v421_v56, %v417_v53  ;;  %v427_v1 = vmul.f32 %v1463_v45, %v425_v57 }
  0xaa   :  { %v514_v2 = vadd.f32 %v512_v42, %v508_v50  ;;  %v524_v4 = vmul.f32 %v1454_v43, %v523_v21  ;;  %v433_v5 = vmul.f32 %v1379_v54, %v431_v59  ;;  %v443_v6 = vstv %s1603_s4 }
  0xab   :  { %413 = vst.msk [vmem:[#allocation4 + $0x18] sm:$0xff] %vm137_vm0, %v411_v32  ;;  %v531_v58 = vadd.f32 %v529_v28, %v527_v61  ;;  %v410_v7 = vadd.f32 %v409_v15, %v406_v63  ;;  %v429_v8 = vadd.f32 %v427_v1, %v423_v0  ;;  %v439_v9 = vmul.f32 %v1431_v37, %v437_v60  ;;  %v575_v0 = vld [vmem:[#allocation4 + $0x8] sm:$0xff] }
  0xac   :  { %v520_v10 = vadd.f32 %v518_v46, %v514_v2  ;;  %v445_v11 = vmul.f32 %v1477_v49, %v443_v6  ;;  %v535_v12 = vstv %s1612_s11  ;;  %v539_v13 = vstv %s1616_s12  ;;  %v581_v2 = vld [vmem:[#allocation4 + $0x38] sm:$0xff] }
  0xad   :  { %533 = vst.msk [vmem:[#allocation4 + $0x48] sm:$0xff] %vm137_vm0, %v531_v58  ;;  %412 = vst.msk [vmem:[#allocation4 + $0x10] sm:$0xff] %vm137_vm0, %v410_v7  ;;  %v435_v14 = vadd.f32 %v433_v5, %v429_v8  ;;  %v537_v17 = vmul.f32 %v1355_v55, %v535_v12  ;;  %v541_v15 = vmul.f32 %v1414_v33, %v539_v13  ;;  %v545_v18 = vstv %s1622_s13 }
  0xae   :  { %v526_v19 = vadd.f32 %v524_v4, %v520_v10  ;;  %v547_v20 = vmul.f32 %v1463_v45, %v545_v18  ;;  %v551_v21 = vstv %s1626_s14  ;;  %v557_v23 = vstv %s1631_s15 }
  0xaf   :  { %v441_v24 = vadd.f32 %v439_v9, %v435_v14  ;;  %v543_v25 = vadd.f32 %v541_v15, %v537_v17  ;;  %v553_v26 = vmul.f32 %v1379_v54, %v551_v21  ;;  %v449_v27 = vstv %s1607_s10 }
  0xb0   :  { %v530_v16 = vadd.f32 %v529_v28, %v526_v19  ;;  %v563_v30 = vstv %s1634_s16  ;;  %v416_v31 = vmul.f32 %v1351_v22, %v415_v47  ;;  %v559_v33 = vmul.f32 %v1431_v37, %v557_v23 }
  0xb1   :  { %v447_v55 = vadd.f32 %v445_v11, %v441_v24  ;;  %v549_v32 = vadd.f32 %v547_v20, %v543_v25  ;;  %v420_v45 = vmul.f32 %v1381_v62, %v419_v48  ;;  %v565_v34 = vmul.f32 %v1477_v49, %v563_v30 }
  0xb2   :  { %532 = vst.msk [vmem:[#allocation4 + $0x40] sm:$0xff] %vm137_vm0, %v530_v16  ;;  %v426_v35 = vmul.f32 %v1433_v38, %v425_v57  ;;  %v432_v54 = vmul.f32 %v1353_v3, %v431_v59  ;;  %v536_v40 = vmul.f32 %v1351_v22, %v535_v12  ;;  %v540_v41 = vmul.f32 %v1381_v62, %v539_v13  ;;  %v577_v12 = vld [vmem:[#allocation4 + $0x18] sm:$0xff] }
  0xb3   :  { %v451_v28 = vadd.f32 %v449_v27, %v447_v55  ;;  %v555_v36 = vadd.f32 %v553_v26, %v549_v32  ;;  %v422_v39 = vadd.f32 %v420_v45, %v416_v31  ;;  %v546_v37 = vmul.f32 %v1433_v38, %v545_v18 }
  0xb4   :  { %v438_v46 = vmul.f32 %v1403_v29, %v437_v60  ;;  %v569_v49 = vstv %s1651_s17  ;;  %v542_v47 = vadd.f32 %v540_v41, %v536_v40  ;;  %v552_v48 = vmul.f32 %v1353_v3, %v551_v21  ;;  %v576_v18 = vld [vmem:[#allocation4 + $0x10] sm:$0xff]  ;;  %v583_v21 = vld [vmem:[#allocation4 + $0x48] sm:$0xff] }
  0xb5   :  { %453 = vst.msk [vmem:[#allocation4 + $0x28] sm:$0xff] %vm137_vm0, %v451_v28  ;;  %v561_v42 = vadd.f32 %v559_v33, %v555_v36  ;;  %v428_v44 = vadd.f32 %v426_v35, %v422_v39  ;;  %v444_v53 = vmul.f32 %v1454_v43, %v443_v6  ;;  %v558_v22 = vmul.f32 %v1403_v29, %v557_v23  ;;  %v574_v6 = vld [vmem:[#allocation4] sm:$0xff] }
  0xb6   :  { %v548_v56 = vadd.f32 %v546_v37, %v542_v47  ;;  %v564_v57 = vmul.f32 %v1454_v43, %v563_v30  ;;  %v580_v43 = vld [vmem:[#allocation4 + $0x30] sm:$0xff] }
  0xb7   :  { %v567_v51 = vadd.f32 %v565_v34, %v561_v42  ;;  %v434_v52 = vadd.f32 %v432_v54, %v428_v44 }
  0xb8   :  { %v554_v38 = vadd.f32 %v552_v48, %v548_v56 }
  0xb9   :  { %v571_v62 = vadd.f32 %v569_v49, %v567_v51  ;;  %v440_v50 = vadd.f32 %v438_v46, %v434_v52  ;;  %v582_v16 = vld [vmem:[#allocation4 + $0x40] sm:$0xff] }
  0xba   :  { %v560_v60 = vadd.f32 %v558_v22, %v554_v38 }
  0xbb   :  { %573 = vst.msk [vmem:[#allocation4 + $0x58] sm:$0xff] %vm137_vm0, %v571_v62  ;;  %v446_v59 = vadd.f32 %v444_v53, %v440_v50 }
  0xbc   :  { %v566_v63 = vadd.f32 %v564_v57, %v560_v60  ;;  %v579_v32 = vld [vmem:[#allocation4 + $0x28] sm:$0xff] }
  0xbd   :  { %v450_v61 = vadd.f32 %v449_v27, %v446_v59 }
  0xbe   :  { %v570_v3 = vadd.f32 %v569_v49, %v566_v63 }
  0xbf   :  { %452 = vst.msk [vmem:[#allocation4 + $0x20] sm:$0xff] %vm137_vm0, %v450_v61 }
  0xc0   :  { %572 = vst.msk [vmem:[#allocation4 + $0x50] sm:$0xff] %vm137_vm0, %v570_v3 }
  0xc2   :  { %v585_v34 = vld [vmem:[#allocation4 + $0x58] sm:$0xff] }
  0xc6   :  { %v578_v54 = vld [vmem:[#allocation4 + $0x20] sm:$0xff] }
  0xc7   :  { %v584_v41 = vld [vmem:[#allocation4 + $0x50] sm:$0xff] }
 0x149   :  { %v938_v1 = vpop.f32.mrf.mxu0 }
 0x14a   :  { %v947_v29 = vpop.f32.mrf.mxu1  ;;  %v766_v4 = vmul.f32 8.0, %v938_v1 }
 0x14b   :  { %v772_v5 = vmul.f32 8.0, %v947_v29  ;;  %v706_v58 = vpop.f32.mrf.mxu0 }
 0x14c   :  { %v736_v7 = vpop.f32.mrf.mxu1  ;;  %v778_v8 = vadd.f32 %v766_v4, %v575_v0  ;;  %v765_v10 = vmul.f32 8.0, %v706_v58 }
 0x14d   :  { %v784_v9 = vadd.f32 %v772_v5, %v581_v2  ;;  %v771_v11 = vmul.f32 8.0, %v736_v7  ;;  %v941_v13 = vpop.f32.mrf.mxu0 }
 0x14e   :  { %802 = vst.msk [vmem:[%s1731_s7 + $0x68] sm:$0xff] %vm137_vm0, %v778_v8  ;;  %v777_v14 = vadd.f32 %v765_v10, %v574_v6  ;;  %v768_v15 = vmul.f32 8.0, %v941_v13 }
 0x14f   :  { %808 = vst.msk [vmem:[%s1731_s7 + $0x98] sm:$0xff] %vm137_vm0, %v784_v9  ;;  %v783_v17 = vadd.f32 %v771_v11, %v580_v43  ;;  %v716_v19 = vpop.f32.mrf.mxu0 }
 0x150   :  { %801 = vst.msk [vmem:[%s1731_s7 + $0x60] sm:$0xff] %vm137_vm0, %v777_v14  ;;  %v780_v20 = vadd.f32 %v768_v15, %v577_v12  ;;  %v767_v24 = vmul.f32 8.0, %v716_v19 }
 0x151   :  { %807 = vst.msk [vmem:[%s1731_s7 + $0x90] sm:$0xff] %vm137_vm0, %v783_v17  ;;  %v950_v23 = vpop.f32.mrf.mxu1 }
 0x152   :  { %v774_v25 = vmul.f32 8.0, %v950_v23  ;;  %804 = vst.msk [vmem:[%s1731_s7 + $0x78] sm:$0xff] %vm137_vm0, %v780_v20  ;;  %v779_v26 = vadd.f32 %v767_v24, %v576_v18 }
 0x153   :  { %v746_v27 = vpop.f32.mrf.mxu1 }
 0x154   :  { %v786_v30 = vadd.f32 %v774_v25, %v583_v21  ;;  %v773_v31 = vmul.f32 8.0, %v746_v27  ;;  %803 = vst.msk [vmem:[%s1731_s7 + $0x70] sm:$0xff] %vm137_vm0, %v779_v26 }
 0x155   :  { %v944_v33 = vpop.f32.mrf.mxu0 }
 0x156   :  { %810 = vst.msk [vmem:[%s1731_s7 + $0xa8] sm:$0xff] %vm137_vm0, %v786_v30  ;;  %v785_v55 = vadd.f32 %v773_v31, %v582_v16  ;;  %v770_v45 = vmul.f32 8.0, %v944_v33  ;;  %v953_v35 = vpop.f32.mrf.mxu1 }
 0x157   :  { %v726_v28 = vpop.f32.mrf.mxu0  ;;  %v776_v39 = vmul.f32 8.0, %v953_v35 }
 0x158   :  { %809 = vst.msk [vmem:[%s1731_s7 + $0xa0] sm:$0xff] %vm137_vm0, %v785_v55  ;;  %v782_v36 = vadd.f32 %v770_v45, %v579_v32  ;;  %v769_v40 = vmul.f32 8.0, %v726_v28  ;;  %v756_v37 = vpop.f32.mrf.mxu1 }
 0x159   :  { %v788_v42 = vadd.f32 %v776_v39, %v585_v34  ;;  %v775_v46 = vmul.f32 8.0, %v756_v37 }
 0x15a   :  { %806 = vst.msk [vmem:[%s1731_s7 + $0x88] sm:$0xff] %vm137_vm0, %v782_v36  ;;  %v781_v44 = vadd.f32 %v769_v40, %v578_v54 }
 0x15b   :  { %812 = vst.msk [vmem:[%s1731_s7 + $0xb8] sm:$0xff] %vm137_vm0, %v788_v42  ;;  %v787_v49 = vadd.f32 %v775_v46, %v584_v41 }
 0x15c   :  { %805 = vst.msk [vmem:[%s1731_s7 + $0x80] sm:$0xff] %vm137_vm0, %v781_v44 }
 0x15d   :  { %811 = vst.msk [vmem:[%s1731_s7 + $0xb0] sm:$0xff] %vm137_vm0, %v787_v49 }
 0x15e   :  { %817 = vsyncpa [#allocation6], 1 }
 0x15f   :  { %818 = vsyncpa [#allocation7], 1 }
 0x160   :  { %819 = vsyncpa [#allocation10], 1 }
 0x161   :  { %820 = vsyncpa [#allocation13], 1 }
 0x162   :  { %821 = vsyncpa [#allocation16], 1 }

</bundles_post_ra>
